<compile_context>
chip_gen: v7x
topology: tpu7x:2x2x1
jax: 0.10.0
libtpu: 0.0.40
codegen_flags: <defaults>
</compile_context>

<pallas_src>
import jax
import jax.numpy as jnp
import numpy as np
from jax import lax
from jax.experimental import pallas as pl
from jax.experimental.pallas import tpu as pltpu

# ---- module-level constants from the PyTorch script ----
A_THRESH = 0.5      # "a"
P_THRESH = 0.5      # "p"  (only used via the sign trick: sigmoid(x)>0.5 <=> x>0)
HIDDEN_SIZE = 64
INPUT_SIZE = 3

# ---- packed / padded kernel layout ----
H = HIDDEN_SIZE
GB = 128                    # lane width of one packed block
NCOLS = 3 * GB              # [ i|f ] [ g|o ] [ sw_i, sw_g, pad... ]
HP = 128                    # hidden state padded to one full lane block (64 real)


def _fused_lstm_kernel(gx_ref, wh_ref, h0_ref, c0_ref, hs_ref, c_ref, h_s):
    # gx_ref : (TC, B, NCOLS) f32   precomputed x@Wx + b for this time chunk
    # wh_ref : (HP, NCOLS)    bf16  hidden->gates weights (VMEM-resident)
    # h0_ref, c0_ref : (B, HP) f32  initial state (used only at chunk 0)
    # hs_ref : (TC, B, HP) f32      per-step hidden outputs for this chunk
    # c_ref  : (B, HP) f32          final cell state; constant block index -> resident
    #                               in VMEM across the grid and doubles as the c carry
    # h_s    : (B, HP) f32          VMEM scratch carrying the recurrent hidden state
    tc = gx_ref.shape[0]
    batch = h0_ref.shape[0]

    @pl.when(pl.program_id(0) == 0)
    def _init():
        h_s[...] = h0_ref[...]
        c_ref[...] = c0_ref[...]

    # Hoisted loop-invariant pieces (JAX does not CSE broadcasts/iotas).
    lane = lax.broadcasted_iota(jnp.int32, (batch, GB), 1)
    is_i_lane = lane == 0
    is_g_lane = lane == 1
    thresh = jnp.float32(batch * A_THRESH)

    for step in range(tc):          # fully unrolled (tc is small and static)
        # ---- recurrent gate matmul on the MXU (bf16 operands, f32 accumulate) ----
        h_bf = h_s[...].astype(jnp.bfloat16)
        gates = gx_ref[step] + jnp.dot(h_bf, wh_ref[...],
                                       preferred_element_type=jnp.float32)  # (B, NCOLS)

        b_if = gates[:, 0 * GB:1 * GB]          # [ i | f ] logits
        b_go = gates[:, 1 * GB:2 * GB]          # [ g | o ] logits
        b_sw = gates[:, 2 * GB:3 * GB]          # raw switch logits (lanes 0,1 real, rest 0)

        sif = jax.nn.sigmoid(b_if)              # [ sig(i) | sig(f) ]
        tgo = jnp.tanh(b_go)                    # [ tanh(g) |  ...   ]
        sgo = jax.nn.sigmoid(b_go)              # [  ...    | sig(o) ]

        i_ = sif                                        # real in lanes 0:H
        f_ = pltpu.roll(sif, shift=H, axis=1)           # f brought to lanes 0:H
        g_ = tgo
        o_ = pltpu.roll(sgo, shift=H, axis=1)

        # ---- switch decision (host-side .item() branch in torch) ----
        # sigmoid(x) > p with p = 0.5  <=>  x > 0, so no transcendental needed.
        pos = b_sw > 0.0
        cnt_i = jnp.sum(jnp.logical_and(pos, is_i_lane).astype(jnp.float32))
        cnt_g = jnp.sum(jnp.logical_and(pos, is_g_lane).astype(jnp.float32))
        cond_i = jnp.logical_and(cnt_g < thresh, cnt_i > thresh)
        cond_g = jnp.logical_and(cnt_g > thresh, cnt_i < thresh)

        # select the gate contribution only (no full candidate cell tensors)
        gate_term = jnp.where(cond_i, i_, jnp.where(cond_g, g_, i_ * g_))
        c_next = f_ * c_ref[...] + gate_term
        h_next = o_ * jnp.tanh(c_next)

        h_s[...] = h_next
        c_ref[...] = c_next
        hs_ref[step] = h_next


def _pick_chunk(T, max_chunk):
    tc = 1
    for d in range(1, min(T, max_chunk) + 1):
        if T % d == 0:
            tc = d
    return tc


def simple_lstm_switching_sequence(xs, h0, c0, packed_params, max_chunk=256):
    """Run the cell over a sequence.

    xs: (T, B, input_size); h0, c0: (B, hidden_size).
    Returns (hs, h_last, c_last) with hs: (T, B, hidden_size).
    """
    wx, wh, bias = packed_params
    T, B, _ = xs.shape
    Hh = h0.shape[1]
    TC = _pick_chunk(T, max_chunk)

    # Hoisted input projection + bias (independent of h -> off the serial path).
    gates_x = jnp.einsum('tbi,ic->tbc', xs.astype(jnp.float32), wx) + bias   # (T,B,NCOLS) f32

    h0_pad = jnp.pad(h0.astype(jnp.float32), ((0, 0), (0, HP - Hh)))
    c0_pad = jnp.pad(c0.astype(jnp.float32), ((0, 0), (0, HP - Hh)))

    hs_pad, c_pad = pl.pallas_call(
        _fused_lstm_kernel,
        out_shape=(jax.ShapeDtypeStruct((T, B, HP), jnp.float32),
                   jax.ShapeDtypeStruct((B, HP), jnp.float32)),
        grid_spec=pltpu.PrefetchScalarGridSpec(
            num_scalar_prefetch=0,
            grid=(T // TC,),
            in_specs=[
                pl.BlockSpec((TC, B, NCOLS), lambda c: (c, 0, 0)),   # gates_x chunk
                pl.BlockSpec((HP, NCOLS), lambda c: (0, 0)),         # wh (VMEM-resident)
                pl.BlockSpec((B, HP), lambda c: (0, 0)),             # h0
                pl.BlockSpec((B, HP), lambda c: (0, 0)),             # c0
            ],
            out_specs=(
                pl.BlockSpec((TC, B, HP), lambda c: (c, 0, 0)),      # hs chunk
                pl.BlockSpec((B, HP), lambda c: (0, 0)),             # final c (resident carry)
            ),
            scratch_shapes=[pltpu.VMEM((B, HP), jnp.float32)],       # h carry
        ),
        compiler_params=pltpu.CompilerParams(
            dimension_semantics=("arbitrary",)),                     # time is sequential
    )(gates_x, wh, h0_pad, c0_pad)

    hs = hs_pad[:, :, :Hh]
    return hs, hs[-1], c_pad[:, :Hh]


def simple_lstm_cell(x, h_cur, c_cur, packed_params):
    """Single-step forward, matching the PyTorch module interface."""
    _, h_next, c_next = simple_lstm_switching_sequence(x[None], h_cur, c_cur,
                                                       packed_params)
    return h_next, c_next


# ---------------------------------------------------------------------------
# Parameter init (mimics the PyTorch module) and packing into kernel layout.
# ---------------------------------------------------------------------------
def init_params(key, input_size=INPUT_SIZE, hidden_size=HIDDEN_SIZE):
    D = input_size + hidden_size
    ks = jax.random.split(key, 12)
    bound = 1.0 / float(np.sqrt(D))            # nn.Linear default init range

    def lin_w(k, out):   # stored transposed: (D, out) so y = x @ W + b
        return jax.random.uniform(k, (D, out), jnp.float32, -bound, bound)

    def lin_b(k, out):
        return jax.random.uniform(k, (1, out), jnp.float32, -bound, bound)

    w_i, w_f, w_g, w_o = (lin_w(ks[0], hidden_size), lin_w(ks[1], hidden_size),
                          lin_w(ks[2], hidden_size), lin_w(ks[3], hidden_size))
    b_i, b_f, b_g, b_o = (lin_b(ks[4], hidden_size), lin_b(ks[5], hidden_size),
                          lin_b(ks[6], hidden_size), lin_b(ks[7], hidden_size))
    # switch gates: normal(0, 0.01) init (weight and bias)
    w_si = 0.01 * jax.random.normal(ks[8], (D, 1), jnp.float32)
    w_sg = 0.01 * jax.random.normal(ks[9], (D, 1), jnp.float32)
    b_si = 0.01 * jax.random.normal(ks[10], (1, 1), jnp.float32)
    b_sg = 0.01 * jax.random.normal(ks[11], (1, 1), jnp.float32)
    return (w_i, w_f, w_g, w_o, b_i, b_f, b_g, b_o, w_si, w_sg, b_si, b_sg)


def pack_params(raw, input_size=INPUT_SIZE, hidden_size=HIDDEN_SIZE):
    (w_i, w_f, w_g, w_o, b_i, b_f, b_g, b_o, w_si, w_sg, b_si, b_sg) = raw
    D = input_size + hidden_size
    Hh = hidden_size

    W = jnp.zeros((D, NCOLS), jnp.float32)
    Bv = jnp.zeros((1, NCOLS), jnp.float32)
    # block 0: [ i | f ], block 1: [ g | o ], block 2: [ sw_i, sw_g, pad ]
    for off, (w, b) in ((0, (w_i, b_i)), (Hh, (w_f, b_f)),
                        (GB, (w_g, b_g)), (GB + Hh, (w_o, b_o))):
        W = W.at[:, off:off + Hh].set(w)
        Bv = Bv.at[:, off:off + Hh].set(b)
    W = W.at[:, 2 * GB:2 * GB + 1].set(w_si).at[:, 2 * GB + 1:2 * GB + 2].set(w_sg)
    Bv = Bv.at[:, 2 * GB:2 * GB + 1].set(b_si).at[:, 2 * GB + 1:2 * GB + 2].set(b_sg)

    wx = W[:input_size]                                                    # (in, NCOLS) f32
    wh = jnp.zeros((HP, NCOLS), jnp.float32).at[:Hh].set(W[input_size:])   # rows H..127 zero
    return wx, wh.astype(jnp.bfloat16), Bv


# ---------------------------------------------------------------------------
# Pure-JAX reference of the PyTorch forward semantics, written against the RAW
# (unpacked) parameters.  The hidden-path matmul mimics the kernel's bf16 MXU
# operands (f32 accumulate); everything else is f32.
# ---------------------------------------------------------------------------
def _reference_sequence(xs, h0, c0, raw, input_size=INPUT_SIZE,
                        hidden_size=HIDDEN_SIZE):
    (w_i, w_f, w_g, w_o, b_i, b_f, b_g, b_o, w_si, w_sg, b_si, b_sg) = raw

    def lin(x, hb, w, b):
        wxp = w[:input_size]
        whp = w[input_size:].astype(jnp.bfloat16).astype(jnp.float32)
        return (jnp.dot(x, wxp, precision=lax.Precision.HIGHEST)
                + jnp.dot(hb, whp, precision=lax.Precision.HIGHEST) + b)

    h, c = h0.astype(jnp.float32), c0.astype(jnp.float32)
    B = xs.shape[1]
    hs = []
    for t in range(xs.shape[0]):
        x = xs[t].astype(jnp.float32)
        hb = h.astype(jnp.bfloat16).astype(jnp.float32)
        i = jax.nn.sigmoid(lin(x, hb, w_i, b_i))
        f = jax.nn.sigmoid(lin(x, hb, w_f, b_f))
        g = jnp.tanh(lin(x, hb, w_g, b_g))
        o = jax.nn.sigmoid(lin(x, hb, w_o, b_o))
        sw_i = lin(x, hb, w_si, b_si)[:, 0]
        sw_g = lin(x, hb, w_sg, b_sg)[:, 0]
        # sigmoid(x) > 0.5  <=>  x > 0 (p = 0.5)
        cnt_i = jnp.sum((sw_i > 0.0).astype(jnp.float32))
        cnt_g = jnp.sum((sw_g > 0.0).astype(jnp.float32))
        thr = B * A_THRESH
        gate_term = jnp.where(jnp.logical_and(cnt_g < thr, cnt_i > thr), i,
                              jnp.where(jnp.logical_and(cnt_g > thr, cnt_i < thr),
                                        g, i * g))
        c = f * c + gate_term
        h = o * jnp.tanh(c)
        hs.append(h)
    return jnp.stack(hs), h, c


if __name__ == "__main__":
    key = jax.random.PRNGKey(0)
    k_p, k_x, k_h, k_c = jax.random.split(key, 4)

    B, T = 8, 16
    raw = init_params(k_p, INPUT_SIZE, HIDDEN_SIZE)
    params = pack_params(raw, INPUT_SIZE, HIDDEN_SIZE)

    xs = jax.random.normal(k_x, (T, B, INPUT_SIZE), jnp.float32)
    h0 = jax.random.normal(k_h, (B, HIDDEN_SIZE), jnp.float32)
    c0 = jax.random.normal(k_c, (B, HIDDEN_SIZE), jnp.float32)

    # fused time-chunked kernel (max_chunk=8 -> grid=(2,), exercises the carry)
    hs, h_last, c_last = simple_lstm_switching_sequence(xs, h0, c0, params,
                                                        max_chunk=8)
    jax.block_until_ready((hs, h_last, c_last))

    # single-step interface (matches the PyTorch module call)
    h1, c1 = simple_lstm_cell(xs[0], h0, c0, params)
    jax.block_until_ready((h1, c1))

    # correctness vs pure-JAX reference on the raw (unpacked) parameters
    hs_ref, h_ref, c_ref = _reference_sequence(xs, h0, c0, raw)
    c1_ref = _reference_sequence(xs[:1], h0, c0, raw)[2]
    assert jnp.allclose(hs, hs_ref, atol=2e-3, rtol=2e-3)
    assert jnp.allclose(h_last, h_ref, atol=2e-3, rtol=2e-3)
    assert jnp.allclose(c_last, c_ref, atol=2e-3, rtol=2e-3)
    assert jnp.allclose(h1, hs_ref[0], atol=2e-3, rtol=2e-3)
    assert jnp.allclose(c1, c1_ref, atol=2e-3, rtol=2e-3)

    print("KERNEL_OK")
</pallas_src>

<mosaic_0001>
module attributes {stable_mosaic.version = 11 : i64} {
  func.func @_fused_lstm_kernel(%arg0: i32, %arg1: memref<8x8x384xf32, #tpu.memory_space<vmem>>, %arg2: memref<128x384xbf16, #tpu.memory_space<vmem>>, %arg3: memref<8x128xf32, #tpu.memory_space<vmem>>, %arg4: memref<8x128xf32, #tpu.memory_space<vmem>>, %arg5: memref<8x8x128xf32, #tpu.memory_space<vmem>>, %arg6: memref<8x128xf32, #tpu.memory_space<vmem>>, %arg7: memref<8x128xf32, #tpu.memory_space<vmem>>) attributes {dimension_semantics = [#tpu.dimension_semantics<arbitrary>], iteration_bounds = array<i64: 2>, scalar_prefetch = 0 : i64, scratch_operands = 1 : i64, tpu.core_type = #tpu.core_type<tc>, window_params = [{transform_indices = @transform_0, window_bounds = array<i64: 8, 8, 384>}, {pipeline_mode = #tpu.pipeline_mode<synchronous>, transform_indices = @transform_1, window_bounds = array<i64: 128, 384>}, {pipeline_mode = #tpu.pipeline_mode<synchronous>, transform_indices = @transform_2, window_bounds = array<i64: 8, 128>}, {pipeline_mode = #tpu.pipeline_mode<synchronous>, transform_indices = @transform_3, window_bounds = array<i64: 8, 128>}, {transform_indices = @transform_4, window_bounds = array<i64: 8, 8, 128>}, {pipeline_mode = #tpu.pipeline_mode<synchronous>, transform_indices = @transform_5, window_bounds = array<i64: 8, 128>}]} {
    %c0_i32 = arith.constant 0 : i32
    %0 = arith.cmpi eq, %arg0, %c0_i32 : i32
    %1 = arith.extui %0 : i1 to i32
    %c0_i32_0 = arith.constant 0 : i32
    %2 = arith.cmpi ne, %1, %c0_i32_0 : i32
    scf.if %2 {
      %c0_216 = arith.constant 0 : index
      %c0_217 = arith.constant 0 : index
      %472 = vector.load %arg3[%c0_216, %c0_217] : memref<8x128xf32, #tpu.memory_space<vmem>>, vector<8x128xf32>
      %c0_218 = arith.constant 0 : index
      %c0_219 = arith.constant 0 : index
      %473 = vector.load %arg7[%c0_218, %c0_219] : memref<8x128xf32, #tpu.memory_space<vmem>>, vector<8x128xf32>
      tpu.vector_store %arg7[%c0_218, %c0_219], %472 {strides = array<i32>} : memref<8x128xf32, #tpu.memory_space<vmem>>, vector<8x128xf32>,
      %c0_220 = arith.constant 0 : index
      %c0_221 = arith.constant 0 : index
      %474 = vector.load %arg4[%c0_220, %c0_221] : memref<8x128xf32, #tpu.memory_space<vmem>>, vector<8x128xf32>
      %c0_222 = arith.constant 0 : index
      %c0_223 = arith.constant 0 : index
      %475 = vector.load %arg6[%c0_222, %c0_223] : memref<8x128xf32, #tpu.memory_space<vmem>>, vector<8x128xf32>
      tpu.vector_store %arg6[%c0_222, %c0_223], %474 {strides = array<i32>} : memref<8x128xf32, #tpu.memory_space<vmem>>, vector<8x128xf32>,
    } else {
    }
    %3 = tpu.iota {dimensions = array<i32: 1>} : vector<8x128xi32>
    %c0_i32_1 = arith.constant 0 : i32
    %4 = vector.broadcast %c0_i32_1 : i32 to vector<8x128xi32>
    %5 = arith.cmpi eq, %3, %4 : vector<8x128xi32>
    %c1_i32 = arith.constant 1 : i32
    %6 = vector.broadcast %c1_i32 : i32 to vector<8x128xi32>
    %7 = arith.cmpi eq, %3, %6 : vector<8x128xi32>
    %c0 = arith.constant 0 : index
    %c0_2 = arith.constant 0 : index
    %8 = vector.load %arg7[%c0, %c0_2] : memref<8x128xf32, #tpu.memory_space<vmem>>, vector<8x128xf32>
    %9 = arith.truncf %8 : vector<8x128xf32> to vector<8x128xbf16>
    %c0_3 = arith.constant 0 : index
    %c0_4 = arith.constant 0 : index
    %c0_5 = arith.constant 0 : index
    %10 = vector.load %arg1[%c0_3, %c0_4, %c0_5] : memref<8x8x384xf32, #tpu.memory_space<vmem>>, vector<1x8x384xf32>
    %11 = vector.shape_cast %10 : vector<1x8x384xf32> to vector<8x384xf32>
    %c0_6 = arith.constant 0 : index
    %c0_7 = arith.constant 0 : index
    %12 = vector.load %arg2[%c0_6, %c0_7] : memref<128x384xbf16, #tpu.memory_space<vmem>>, vector<128x384xbf16>
    %cst = arith.constant dense<0.000000e+00> : vector<8x384xf32>
    %13 = tpu.matmul %9, %12, %cst {dimension_numbers = #tpu.dot_dimension_numbers<[1], [0], [0], [1], [0, 0, 1, 1], [], []>} : vector<8x128xbf16>, vector<128x384xbf16>, vector<8x384xf32> -> vector<8x384xf32>
    %14 = arith.addf %11, %13 : vector<8x384xf32>
    %15 = vector.extract_strided_slice %14 {offsets = [0, 0], sizes = [8, 128], strides = [1, 1]} : vector<8x384xf32> to vector<8x128xf32>
    %16 = vector.extract_strided_slice %14 {offsets = [0, 128], sizes = [8, 128], strides = [1, 1]} : vector<8x384xf32> to vector<8x128xf32>
    %17 = vector.extract_strided_slice %14 {offsets = [0, 256], sizes = [8, 128], strides = [1, 1]} : vector<8x384xf32> to vector<8x128xf32>
    %18 = arith.negf %15 : vector<8x128xf32>
    %19 = math.exp %18 : vector<8x128xf32>
    %cst_8 = arith.constant 1.000000e+00 : f32
    %20 = vector.broadcast %cst_8 : f32 to vector<8x128xf32>
    %21 = arith.addf %20, %19 : vector<8x128xf32>
    %22 = arith.divf %20, %21 : vector<8x128xf32>
    %23 = math.tanh %16 : vector<8x128xf32>
    %24 = arith.negf %16 : vector<8x128xf32>
    %25 = math.exp %24 : vector<8x128xf32>
    %cst_9 = arith.constant 1.000000e+00 : f32
    %26 = vector.broadcast %cst_9 : f32 to vector<8x128xf32>
    %27 = arith.addf %26, %25 : vector<8x128xf32>
    %28 = arith.divf %26, %27 : vector<8x128xf32>
    %c64_i32 = arith.constant 64 : i32
    %29 = tpu.dynamic_rotate %22 by %c64_i32 dim 1 : vector<8x128xf32>, i32 -> vector<8x128xf32>
    %c64_i32_10 = arith.constant 64 : i32
    %30 = tpu.dynamic_rotate %28 by %c64_i32_10 dim 1 : vector<8x128xf32>, i32 -> vector<8x128xf32>
    %cst_11 = arith.constant 0.000000e+00 : f32
    %31 = vector.broadcast %cst_11 : f32 to vector<8x128xf32>
    %32 = arith.cmpf ogt, %17, %31 : vector<8x128xf32>
    %33 = arith.andi %32, %5 : vector<8x128xi1>
    %34 = arith.extui %33 : vector<8x128xi1> to vector<8x128xi32>
    %35 = arith.sitofp %34 : vector<8x128xi32> to vector<8x128xf32>
    %36 = vector.shape_cast %35 : vector<8x128xf32> to vector<1x8x128xf32>
    %cst_12 = arith.constant dense<0.000000e+00> : vector<1xf32>
    %37 = vector.multi_reduction <add>, %36, %cst_12 [1, 2] : vector<1x8x128xf32> to vector<1xf32>
    %38 = vector.shape_cast %37 : vector<1xf32> to vector<1x1x1xf32>
    %39 = vector.extract %38[0, 0, 0] : f32 from vector<1x1x1xf32>
    %40 = arith.andi %32, %7 : vector<8x128xi1>
    %41 = arith.extui %40 : vector<8x128xi1> to vector<8x128xi32>
    %42 = arith.sitofp %41 : vector<8x128xi32> to vector<8x128xf32>
    %43 = vector.shape_cast %42 : vector<8x128xf32> to vector<1x8x128xf32>
    %cst_13 = arith.constant dense<0.000000e+00> : vector<1xf32>
    %44 = vector.multi_reduction <add>, %43, %cst_13 [1, 2] : vector<1x8x128xf32> to vector<1xf32>
    %45 = vector.shape_cast %44 : vector<1xf32> to vector<1x1x1xf32>
    %46 = vector.extract %45[0, 0, 0] : f32 from vector<1x1x1xf32>
    %cst_14 = arith.constant 4.000000e+00 : f32
    %47 = arith.cmpf olt, %46, %cst_14 : f32
    %cst_15 = arith.constant 4.000000e+00 : f32
    %48 = arith.cmpf ogt, %39, %cst_15 : f32
    %49 = arith.andi %47, %48 : i1
    %cst_16 = arith.constant 4.000000e+00 : f32
    %50 = arith.cmpf ogt, %46, %cst_16 : f32
    %cst_17 = arith.constant 4.000000e+00 : f32
    %51 = arith.cmpf olt, %39, %cst_17 : f32
    %52 = arith.andi %50, %51 : i1
    %53 = arith.mulf %22, %23 : vector<8x128xf32>
    %54 = arith.select %52, %23, %53 : vector<8x128xf32>
    %55 = arith.select %49, %22, %54 : vector<8x128xf32>
    %c0_18 = arith.constant 0 : index
    %c0_19 = arith.constant 0 : index
    %56 = vector.load %arg6[%c0_18, %c0_19] : memref<8x128xf32, #tpu.memory_space<vmem>>, vector<8x128xf32>
    %57 = arith.mulf %29, %56 : vector<8x128xf32>
    %58 = arith.addf %57, %55 : vector<8x128xf32>
    %59 = math.tanh %58 : vector<8x128xf32>
    %60 = arith.mulf %30, %59 : vector<8x128xf32>
    %c0_20 = arith.constant 0 : index
    %c0_21 = arith.constant 0 : index
    %61 = vector.load %arg7[%c0_20, %c0_21] : memref<8x128xf32, #tpu.memory_space<vmem>>, vector<8x128xf32>
    tpu.vector_store %arg7[%c0_20, %c0_21], %60 {strides = array<i32>} : memref<8x128xf32, #tpu.memory_space<vmem>>, vector<8x128xf32>,
    %c0_22 = arith.constant 0 : index
    %c0_23 = arith.constant 0 : index
    %62 = vector.load %arg6[%c0_22, %c0_23] : memref<8x128xf32, #tpu.memory_space<vmem>>, vector<8x128xf32>
    tpu.vector_store %arg6[%c0_22, %c0_23], %58 {strides = array<i32>} : memref<8x128xf32, #tpu.memory_space<vmem>>, vector<8x128xf32>,
    %c0_24 = arith.constant 0 : index
    %c0_25 = arith.constant 0 : index
    %c0_26 = arith.constant 0 : index
    %63 = vector.load %arg5[%c0_24, %c0_25, %c0_26] : memref<8x8x128xf32, #tpu.memory_space<vmem>>, vector<1x8x128xf32>
    %64 = vector.shape_cast %63 : vector<1x8x128xf32> to vector<8x128xf32>
    %65 = vector.shape_cast %60 : vector<8x128xf32> to vector<1x8x128xf32>
    tpu.vector_store %arg5[%c0_24, %c0_25, %c0_26], %65 {strides = array<i32>} : memref<8x8x128xf32, #tpu.memory_space<vmem>>, vector<1x8x128xf32>,
    %c0_27 = arith.constant 0 : index
    %c0_28 = arith.constant 0 : index
    %66 = vector.load %arg7[%c0_27, %c0_28] : memref<8x128xf32, #tpu.memory_space<vmem>>, vector<8x128xf32>
    %67 = arith.truncf %66 : vector<8x128xf32> to vector<8x128xbf16>
    %c1 = arith.constant 1 : index
    %c0_29 = arith.constant 0 : index
    %c0_30 = arith.constant 0 : index
    %68 = vector.load %arg1[%c1, %c0_29, %c0_30] : memref<8x8x384xf32, #tpu.memory_space<vmem>>, vector<1x8x384xf32>
    %69 = vector.shape_cast %68 : vector<1x8x384xf32> to vector<8x384xf32>
    %c0_31 = arith.constant 0 : index
    %c0_32 = arith.constant 0 : index
    %70 = vector.load %arg2[%c0_31, %c0_32] : memref<128x384xbf16, #tpu.memory_space<vmem>>, vector<128x384xbf16>
    %cst_33 = arith.constant dense<0.000000e+00> : vector<8x384xf32>
    %71 = tpu.matmul %67, %70, %cst_33 {dimension_numbers = #tpu.dot_dimension_numbers<[1], [0], [0], [1], [0, 0, 1, 1], [], []>} : vector<8x128xbf16>, vector<128x384xbf16>, vector<8x384xf32> -> vector<8x384xf32>
    %72 = arith.addf %69, %71 : vector<8x384xf32>
    %73 = vector.extract_strided_slice %72 {offsets = [0, 0], sizes = [8, 128], strides = [1, 1]} : vector<8x384xf32> to vector<8x128xf32>
    %74 = vector.extract_strided_slice %72 {offsets = [0, 128], sizes = [8, 128], strides = [1, 1]} : vector<8x384xf32> to vector<8x128xf32>
    %75 = vector.extract_strided_slice %72 {offsets = [0, 256], sizes = [8, 128], strides = [1, 1]} : vector<8x384xf32> to vector<8x128xf32>
    %76 = arith.negf %73 : vector<8x128xf32>
    %77 = math.exp %76 : vector<8x128xf32>
    %cst_34 = arith.constant 1.000000e+00 : f32
    %78 = vector.broadcast %cst_34 : f32 to vector<8x128xf32>
    %79 = arith.addf %78, %77 : vector<8x128xf32>
    %80 = arith.divf %78, %79 : vector<8x128xf32>
    %81 = math.tanh %74 : vector<8x128xf32>
    %82 = arith.negf %74 : vector<8x128xf32>
    %83 = math.exp %82 : vector<8x128xf32>
    %cst_35 = arith.constant 1.000000e+00 : f32
    %84 = vector.broadcast %cst_35 : f32 to vector<8x128xf32>
    %85 = arith.addf %84, %83 : vector<8x128xf32>
    %86 = arith.divf %84, %85 : vector<8x128xf32>
    %c64_i32_36 = arith.constant 64 : i32
    %87 = tpu.dynamic_rotate %80 by %c64_i32_36 dim 1 : vector<8x128xf32>, i32 -> vector<8x128xf32>
    %c64_i32_37 = arith.constant 64 : i32
    %88 = tpu.dynamic_rotate %86 by %c64_i32_37 dim 1 : vector<8x128xf32>, i32 -> vector<8x128xf32>
    %cst_38 = arith.constant 0.000000e+00 : f32
    %89 = vector.broadcast %cst_38 : f32 to vector<8x128xf32>
    %90 = arith.cmpf ogt, %75, %89 : vector<8x128xf32>
    %91 = arith.andi %90, %5 : vector<8x128xi1>
    %92 = arith.extui %91 : vector<8x128xi1> to vector<8x128xi32>
    %93 = arith.sitofp %92 : vector<8x128xi32> to vector<8x128xf32>
    %94 = vector.shape_cast %93 : vector<8x128xf32> to vector<1x8x128xf32>
    %cst_39 = arith.constant dense<0.000000e+00> : vector<1xf32>
    %95 = vector.multi_reduction <add>, %94, %cst_39 [1, 2] : vector<1x8x128xf32> to vector<1xf32>
    %96 = vector.shape_cast %95 : vector<1xf32> to vector<1x1x1xf32>
    %97 = vector.extract %96[0, 0, 0] : f32 from vector<1x1x1xf32>
    %98 = arith.andi %90, %7 : vector<8x128xi1>
    %99 = arith.extui %98 : vector<8x128xi1> to vector<8x128xi32>
    %100 = arith.sitofp %99 : vector<8x128xi32> to vector<8x128xf32>
    %101 = vector.shape_cast %100 : vector<8x128xf32> to vector<1x8x128xf32>
    %cst_40 = arith.constant dense<0.000000e+00> : vector<1xf32>
    %102 = vector.multi_reduction <add>, %101, %cst_40 [1, 2] : vector<1x8x128xf32> to vector<1xf32>
    %103 = vector.shape_cast %102 : vector<1xf32> to vector<1x1x1xf32>
    %104 = vector.extract %103[0, 0, 0] : f32 from vector<1x1x1xf32>
    %cst_41 = arith.constant 4.000000e+00 : f32
    %105 = arith.cmpf olt, %104, %cst_41 : f32
    %cst_42 = arith.constant 4.000000e+00 : f32
    %106 = arith.cmpf ogt, %97, %cst_42 : f32
    %107 = arith.andi %105, %106 : i1
    %cst_43 = arith.constant 4.000000e+00 : f32
    %108 = arith.cmpf ogt, %104, %cst_43 : f32
    %cst_44 = arith.constant 4.000000e+00 : f32
    %109 = arith.cmpf olt, %97, %cst_44 : f32
    %110 = arith.andi %108, %109 : i1
    %111 = arith.mulf %80, %81 : vector<8x128xf32>
    %112 = arith.select %110, %81, %111 : vector<8x128xf32>
    %113 = arith.select %107, %80, %112 : vector<8x128xf32>
    %c0_45 = arith.constant 0 : index
    %c0_46 = arith.constant 0 : index
    %114 = vector.load %arg6[%c0_45, %c0_46] : memref<8x128xf32, #tpu.memory_space<vmem>>, vector<8x128xf32>
    %115 = arith.mulf %87, %114 : vector<8x128xf32>
    %116 = arith.addf %115, %113 : vector<8x128xf32>
    %117 = math.tanh %116 : vector<8x128xf32>
    %118 = arith.mulf %88, %117 : vector<8x128xf32>
    %c0_47 = arith.constant 0 : index
    %c0_48 = arith.constant 0 : index
    %119 = vector.load %arg7[%c0_47, %c0_48] : memref<8x128xf32, #tpu.memory_space<vmem>>, vector<8x128xf32>
    tpu.vector_store %arg7[%c0_47, %c0_48], %118 {strides = array<i32>} : memref<8x128xf32, #tpu.memory_space<vmem>>, vector<8x128xf32>,
    %c0_49 = arith.constant 0 : index
    %c0_50 = arith.constant 0 : index
    %120 = vector.load %arg6[%c0_49, %c0_50] : memref<8x128xf32, #tpu.memory_space<vmem>>, vector<8x128xf32>
    tpu.vector_store %arg6[%c0_49, %c0_50], %116 {strides = array<i32>} : memref<8x128xf32, #tpu.memory_space<vmem>>, vector<8x128xf32>,
    %c1_51 = arith.constant 1 : index
    %c0_52 = arith.constant 0 : index
    %c0_53 = arith.constant 0 : index
    %121 = vector.load %arg5[%c1_51, %c0_52, %c0_53] : memref<8x8x128xf32, #tpu.memory_space<vmem>>, vector<1x8x128xf32>
    %122 = vector.shape_cast %121 : vector<1x8x128xf32> to vector<8x128xf32>
    %123 = vector.shape_cast %118 : vector<8x128xf32> to vector<1x8x128xf32>
    tpu.vector_store %arg5[%c1_51, %c0_52, %c0_53], %123 {strides = array<i32>} : memref<8x8x128xf32, #tpu.memory_space<vmem>>, vector<1x8x128xf32>,
    %c0_54 = arith.constant 0 : index
    %c0_55 = arith.constant 0 : index
    %124 = vector.load %arg7[%c0_54, %c0_55] : memref<8x128xf32, #tpu.memory_space<vmem>>, vector<8x128xf32>
    %125 = arith.truncf %124 : vector<8x128xf32> to vector<8x128xbf16>
    %c2 = arith.constant 2 : index
    %c0_56 = arith.constant 0 : index
    %c0_57 = arith.constant 0 : index
    %126 = vector.load %arg1[%c2, %c0_56, %c0_57] : memref<8x8x384xf32, #tpu.memory_space<vmem>>, vector<1x8x384xf32>
    %127 = vector.shape_cast %126 : vector<1x8x384xf32> to vector<8x384xf32>
    %c0_58 = arith.constant 0 : index
    %c0_59 = arith.constant 0 : index
    %128 = vector.load %arg2[%c0_58, %c0_59] : memref<128x384xbf16, #tpu.memory_space<vmem>>, vector<128x384xbf16>
    %cst_60 = arith.constant dense<0.000000e+00> : vector<8x384xf32>
    %129 = tpu.matmul %125, %128, %cst_60 {dimension_numbers = #tpu.dot_dimension_numbers<[1], [0], [0], [1], [0, 0, 1, 1], [], []>} : vector<8x128xbf16>, vector<128x384xbf16>, vector<8x384xf32> -> vector<8x384xf32>
    %130 = arith.addf %127, %129 : vector<8x384xf32>
    %131 = vector.extract_strided_slice %130 {offsets = [0, 0], sizes = [8, 128], strides = [1, 1]} : vector<8x384xf32> to vector<8x128xf32>
    %132 = vector.extract_strided_slice %130 {offsets = [0, 128], sizes = [8, 128], strides = [1, 1]} : vector<8x384xf32> to vector<8x128xf32>
    %133 = vector.extract_strided_slice %130 {offsets = [0, 256], sizes = [8, 128], strides = [1, 1]} : vector<8x384xf32> to vector<8x128xf32>
    %134 = arith.negf %131 : vector<8x128xf32>
    %135 = math.exp %134 : vector<8x128xf32>
    %cst_61 = arith.constant 1.000000e+00 : f32
    %136 = vector.broadcast %cst_61 : f32 to vector<8x128xf32>
    %137 = arith.addf %136, %135 : vector<8x128xf32>
    %138 = arith.divf %136, %137 : vector<8x128xf32>
    %139 = math.tanh %132 : vector<8x128xf32>
    %140 = arith.negf %132 : vector<8x128xf32>
    %141 = math.exp %140 : vector<8x128xf32>
    %cst_62 = arith.constant 1.000000e+00 : f32
    %142 = vector.broadcast %cst_62 : f32 to vector<8x128xf32>
    %143 = arith.addf %142, %141 : vector<8x128xf32>
    %144 = arith.divf %142, %143 : vector<8x128xf32>
    %c64_i32_63 = arith.constant 64 : i32
    %145 = tpu.dynamic_rotate %138 by %c64_i32_63 dim 1 : vector<8x128xf32>, i32 -> vector<8x128xf32>
    %c64_i32_64 = arith.constant 64 : i32
    %146 = tpu.dynamic_rotate %144 by %c64_i32_64 dim 1 : vector<8x128xf32>, i32 -> vector<8x128xf32>
    %cst_65 = arith.constant 0.000000e+00 : f32
    %147 = vector.broadcast %cst_65 : f32 to vector<8x128xf32>
    %148 = arith.cmpf ogt, %133, %147 : vector<8x128xf32>
    %149 = arith.andi %148, %5 : vector<8x128xi1>
    %150 = arith.extui %149 : vector<8x128xi1> to vector<8x128xi32>
    %151 = arith.sitofp %150 : vector<8x128xi32> to vector<8x128xf32>
    %152 = vector.shape_cast %151 : vector<8x128xf32> to vector<1x8x128xf32>
    %cst_66 = arith.constant dense<0.000000e+00> : vector<1xf32>
    %153 = vector.multi_reduction <add>, %152, %cst_66 [1, 2] : vector<1x8x128xf32> to vector<1xf32>
    %154 = vector.shape_cast %153 : vector<1xf32> to vector<1x1x1xf32>
    %155 = vector.extract %154[0, 0, 0] : f32 from vector<1x1x1xf32>
    %156 = arith.andi %148, %7 : vector<8x128xi1>
    %157 = arith.extui %156 : vector<8x128xi1> to vector<8x128xi32>
    %158 = arith.sitofp %157 : vector<8x128xi32> to vector<8x128xf32>
    %159 = vector.shape_cast %158 : vector<8x128xf32> to vector<1x8x128xf32>
    %cst_67 = arith.constant dense<0.000000e+00> : vector<1xf32>
    %160 = vector.multi_reduction <add>, %159, %cst_67 [1, 2] : vector<1x8x128xf32> to vector<1xf32>
    %161 = vector.shape_cast %160 : vector<1xf32> to vector<1x1x1xf32>
    %162 = vector.extract %161[0, 0, 0] : f32 from vector<1x1x1xf32>
    %cst_68 = arith.constant 4.000000e+00 : f32
    %163 = arith.cmpf olt, %162, %cst_68 : f32
    %cst_69 = arith.constant 4.000000e+00 : f32
    %164 = arith.cmpf ogt, %155, %cst_69 : f32
    %165 = arith.andi %163, %164 : i1
    %cst_70 = arith.constant 4.000000e+00 : f32
    %166 = arith.cmpf ogt, %162, %cst_70 : f32
    %cst_71 = arith.constant 4.000000e+00 : f32
    %167 = arith.cmpf olt, %155, %cst_71 : f32
    %168 = arith.andi %166, %167 : i1
    %169 = arith.mulf %138, %139 : vector<8x128xf32>
    %170 = arith.select %168, %139, %169 : vector<8x128xf32>
    %171 = arith.select %165, %138, %170 : vector<8x128xf32>
    %c0_72 = arith.constant 0 : index
    %c0_73 = arith.constant 0 : index
    %172 = vector.load %arg6[%c0_72, %c0_73] : memref<8x128xf32, #tpu.memory_space<vmem>>, vector<8x128xf32>
    %173 = arith.mulf %145, %172 : vector<8x128xf32>
    %174 = arith.addf %173, %171 : vector<8x128xf32>
    %175 = math.tanh %174 : vector<8x128xf32>
    %176 = arith.mulf %146, %175 : vector<8x128xf32>
    %c0_74 = arith.constant 0 : index
    %c0_75 = arith.constant 0 : index
    %177 = vector.load %arg7[%c0_74, %c0_75] : memref<8x128xf32, #tpu.memory_space<vmem>>, vector<8x128xf32>
    tpu.vector_store %arg7[%c0_74, %c0_75], %176 {strides = array<i32>} : memref<8x128xf32, #tpu.memory_space<vmem>>, vector<8x128xf32>,
    %c0_76 = arith.constant 0 : index
    %c0_77 = arith.constant 0 : index
    %178 = vector.load %arg6[%c0_76, %c0_77] : memref<8x128xf32, #tpu.memory_space<vmem>>, vector<8x128xf32>
    tpu.vector_store %arg6[%c0_76, %c0_77], %174 {strides = array<i32>} : memref<8x128xf32, #tpu.memory_space<vmem>>, vector<8x128xf32>,
    %c2_78 = arith.constant 2 : index
    %c0_79 = arith.constant 0 : index
    %c0_80 = arith.constant 0 : index
    %179 = vector.load %arg5[%c2_78, %c0_79, %c0_80] : memref<8x8x128xf32, #tpu.memory_space<vmem>>, vector<1x8x128xf32>
    %180 = vector.shape_cast %179 : vector<1x8x128xf32> to vector<8x128xf32>
    %181 = vector.shape_cast %176 : vector<8x128xf32> to vector<1x8x128xf32>
    tpu.vector_store %arg5[%c2_78, %c0_79, %c0_80], %181 {strides = array<i32>} : memref<8x8x128xf32, #tpu.memory_space<vmem>>, vector<1x8x128xf32>,
    %c0_81 = arith.constant 0 : index
    %c0_82 = arith.constant 0 : index
    %182 = vector.load %arg7[%c0_81, %c0_82] : memref<8x128xf32, #tpu.memory_space<vmem>>, vector<8x128xf32>
    %183 = arith.truncf %182 : vector<8x128xf32> to vector<8x128xbf16>
    %c3 = arith.constant 3 : index
    %c0_83 = arith.constant 0 : index
    %c0_84 = arith.constant 0 : index
    %184 = vector.load %arg1[%c3, %c0_83, %c0_84] : memref<8x8x384xf32, #tpu.memory_space<vmem>>, vector<1x8x384xf32>
    %185 = vector.shape_cast %184 : vector<1x8x384xf32> to vector<8x384xf32>
    %c0_85 = arith.constant 0 : index
    %c0_86 = arith.constant 0 : index
    %186 = vector.load %arg2[%c0_85, %c0_86] : memref<128x384xbf16, #tpu.memory_space<vmem>>, vector<128x384xbf16>
    %cst_87 = arith.constant dense<0.000000e+00> : vector<8x384xf32>
    %187 = tpu.matmul %183, %186, %cst_87 {dimension_numbers = #tpu.dot_dimension_numbers<[1], [0], [0], [1], [0, 0, 1, 1], [], []>} : vector<8x128xbf16>, vector<128x384xbf16>, vector<8x384xf32> -> vector<8x384xf32>
    %188 = arith.addf %185, %187 : vector<8x384xf32>
    %189 = vector.extract_strided_slice %188 {offsets = [0, 0], sizes = [8, 128], strides = [1, 1]} : vector<8x384xf32> to vector<8x128xf32>
    %190 = vector.extract_strided_slice %188 {offsets = [0, 128], sizes = [8, 128], strides = [1, 1]} : vector<8x384xf32> to vector<8x128xf32>
    %191 = vector.extract_strided_slice %188 {offsets = [0, 256], sizes = [8, 128], strides = [1, 1]} : vector<8x384xf32> to vector<8x128xf32>
    %192 = arith.negf %189 : vector<8x128xf32>
    %193 = math.exp %192 : vector<8x128xf32>
    %cst_88 = arith.constant 1.000000e+00 : f32
    %194 = vector.broadcast %cst_88 : f32 to vector<8x128xf32>
    %195 = arith.addf %194, %193 : vector<8x128xf32>
    %196 = arith.divf %194, %195 : vector<8x128xf32>
    %197 = math.tanh %190 : vector<8x128xf32>
    %198 = arith.negf %190 : vector<8x128xf32>
    %199 = math.exp %198 : vector<8x128xf32>
    %cst_89 = arith.constant 1.000000e+00 : f32
    %200 = vector.broadcast %cst_89 : f32 to vector<8x128xf32>
    %201 = arith.addf %200, %199 : vector<8x128xf32>
    %202 = arith.divf %200, %201 : vector<8x128xf32>
    %c64_i32_90 = arith.constant 64 : i32
    %203 = tpu.dynamic_rotate %196 by %c64_i32_90 dim 1 : vector<8x128xf32>, i32 -> vector<8x128xf32>
    %c64_i32_91 = arith.constant 64 : i32
    %204 = tpu.dynamic_rotate %202 by %c64_i32_91 dim 1 : vector<8x128xf32>, i32 -> vector<8x128xf32>
    %cst_92 = arith.constant 0.000000e+00 : f32
    %205 = vector.broadcast %cst_92 : f32 to vector<8x128xf32>
    %206 = arith.cmpf ogt, %191, %205 : vector<8x128xf32>
    %207 = arith.andi %206, %5 : vector<8x128xi1>
    %208 = arith.extui %207 : vector<8x128xi1> to vector<8x128xi32>
    %209 = arith.sitofp %208 : vector<8x128xi32> to vector<8x128xf32>
    %210 = vector.shape_cast %209 : vector<8x128xf32> to vector<1x8x128xf32>
    %cst_93 = arith.constant dense<0.000000e+00> : vector<1xf32>
    %211 = vector.multi_reduction <add>, %210, %cst_93 [1, 2] : vector<1x8x128xf32> to vector<1xf32>
    %212 = vector.shape_cast %211 : vector<1xf32> to vector<1x1x1xf32>
    %213 = vector.extract %212[0, 0, 0] : f32 from vector<1x1x1xf32>
    %214 = arith.andi %206, %7 : vector<8x128xi1>
    %215 = arith.extui %214 : vector<8x128xi1> to vector<8x128xi32>
    %216 = arith.sitofp %215 : vector<8x128xi32> to vector<8x128xf32>
    %217 = vector.shape_cast %216 : vector<8x128xf32> to vector<1x8x128xf32>
    %cst_94 = arith.constant dense<0.000000e+00> : vector<1xf32>
    %218 = vector.multi_reduction <add>, %217, %cst_94 [1, 2] : vector<1x8x128xf32> to vector<1xf32>
    %219 = vector.shape_cast %218 : vector<1xf32> to vector<1x1x1xf32>
    %220 = vector.extract %219[0, 0, 0] : f32 from vector<1x1x1xf32>
    %cst_95 = arith.constant 4.000000e+00 : f32
    %221 = arith.cmpf olt, %220, %cst_95 : f32
    %cst_96 = arith.constant 4.000000e+00 : f32
    %222 = arith.cmpf ogt, %213, %cst_96 : f32
    %223 = arith.andi %221, %222 : i1
    %cst_97 = arith.constant 4.000000e+00 : f32
    %224 = arith.cmpf ogt, %220, %cst_97 : f32
    %cst_98 = arith.constant 4.000000e+00 : f32
    %225 = arith.cmpf olt, %213, %cst_98 : f32
    %226 = arith.andi %224, %225 : i1
    %227 = arith.mulf %196, %197 : vector<8x128xf32>
    %228 = arith.select %226, %197, %227 : vector<8x128xf32>
    %229 = arith.select %223, %196, %228 : vector<8x128xf32>
    %c0_99 = arith.constant 0 : index
    %c0_100 = arith.constant 0 : index
    %230 = vector.load %arg6[%c0_99, %c0_100] : memref<8x128xf32, #tpu.memory_space<vmem>>, vector<8x128xf32>
    %231 = arith.mulf %203, %230 : vector<8x128xf32>
    %232 = arith.addf %231, %229 : vector<8x128xf32>
    %233 = math.tanh %232 : vector<8x128xf32>
    %234 = arith.mulf %204, %233 : vector<8x128xf32>
    %c0_101 = arith.constant 0 : index
    %c0_102 = arith.constant 0 : index
    %235 = vector.load %arg7[%c0_101, %c0_102] : memref<8x128xf32, #tpu.memory_space<vmem>>, vector<8x128xf32>
    tpu.vector_store %arg7[%c0_101, %c0_102], %234 {strides = array<i32>} : memref<8x128xf32, #tpu.memory_space<vmem>>, vector<8x128xf32>,
    %c0_103 = arith.constant 0 : index
    %c0_104 = arith.constant 0 : index
    %236 = vector.load %arg6[%c0_103, %c0_104] : memref<8x128xf32, #tpu.memory_space<vmem>>, vector<8x128xf32>
    tpu.vector_store %arg6[%c0_103, %c0_104], %232 {strides = array<i32>} : memref<8x128xf32, #tpu.memory_space<vmem>>, vector<8x128xf32>,
    %c3_105 = arith.constant 3 : index
    %c0_106 = arith.constant 0 : index
    %c0_107 = arith.constant 0 : index
    %237 = vector.load %arg5[%c3_105, %c0_106, %c0_107] : memref<8x8x128xf32, #tpu.memory_space<vmem>>, vector<1x8x128xf32>
    %238 = vector.shape_cast %237 : vector<1x8x128xf32> to vector<8x128xf32>
    %239 = vector.shape_cast %234 : vector<8x128xf32> to vector<1x8x128xf32>
    tpu.vector_store %arg5[%c3_105, %c0_106, %c0_107], %239 {strides = array<i32>} : memref<8x8x128xf32, #tpu.memory_space<vmem>>, vector<1x8x128xf32>,
    %c0_108 = arith.constant 0 : index
    %c0_109 = arith.constant 0 : index
    %240 = vector.load %arg7[%c0_108, %c0_109] : memref<8x128xf32, #tpu.memory_space<vmem>>, vector<8x128xf32>
    %241 = arith.truncf %240 : vector<8x128xf32> to vector<8x128xbf16>
    %c4 = arith.constant 4 : index
    %c0_110 = arith.constant 0 : index
    %c0_111 = arith.constant 0 : index
    %242 = vector.load %arg1[%c4, %c0_110, %c0_111] : memref<8x8x384xf32, #tpu.memory_space<vmem>>, vector<1x8x384xf32>
    %243 = vector.shape_cast %242 : vector<1x8x384xf32> to vector<8x384xf32>
    %c0_112 = arith.constant 0 : index
    %c0_113 = arith.constant 0 : index
    %244 = vector.load %arg2[%c0_112, %c0_113] : memref<128x384xbf16, #tpu.memory_space<vmem>>, vector<128x384xbf16>
    %cst_114 = arith.constant dense<0.000000e+00> : vector<8x384xf32>
    %245 = tpu.matmul %241, %244, %cst_114 {dimension_numbers = #tpu.dot_dimension_numbers<[1], [0], [0], [1], [0, 0, 1, 1], [], []>} : vector<8x128xbf16>, vector<128x384xbf16>, vector<8x384xf32> -> vector<8x384xf32>
    %246 = arith.addf %243, %245 : vector<8x384xf32>
    %247 = vector.extract_strided_slice %246 {offsets = [0, 0], sizes = [8, 128], strides = [1, 1]} : vector<8x384xf32> to vector<8x128xf32>
    %248 = vector.extract_strided_slice %246 {offsets = [0, 128], sizes = [8, 128], strides = [1, 1]} : vector<8x384xf32> to vector<8x128xf32>
    %249 = vector.extract_strided_slice %246 {offsets = [0, 256], sizes = [8, 128], strides = [1, 1]} : vector<8x384xf32> to vector<8x128xf32>
    %250 = arith.negf %247 : vector<8x128xf32>
    %251 = math.exp %250 : vector<8x128xf32>
    %cst_115 = arith.constant 1.000000e+00 : f32
    %252 = vector.broadcast %cst_115 : f32 to vector<8x128xf32>
    %253 = arith.addf %252, %251 : vector<8x128xf32>
    %254 = arith.divf %252, %253 : vector<8x128xf32>
    %255 = math.tanh %248 : vector<8x128xf32>
    %256 = arith.negf %248 : vector<8x128xf32>
    %257 = math.exp %256 : vector<8x128xf32>
    %cst_116 = arith.constant 1.000000e+00 : f32
    %258 = vector.broadcast %cst_116 : f32 to vector<8x128xf32>
    %259 = arith.addf %258, %257 : vector<8x128xf32>
    %260 = arith.divf %258, %259 : vector<8x128xf32>
    %c64_i32_117 = arith.constant 64 : i32
    %261 = tpu.dynamic_rotate %254 by %c64_i32_117 dim 1 : vector<8x128xf32>, i32 -> vector<8x128xf32>
    %c64_i32_118 = arith.constant 64 : i32
    %262 = tpu.dynamic_rotate %260 by %c64_i32_118 dim 1 : vector<8x128xf32>, i32 -> vector<8x128xf32>
    %cst_119 = arith.constant 0.000000e+00 : f32
    %263 = vector.broadcast %cst_119 : f32 to vector<8x128xf32>
    %264 = arith.cmpf ogt, %249, %263 : vector<8x128xf32>
    %265 = arith.andi %264, %5 : vector<8x128xi1>
    %266 = arith.extui %265 : vector<8x128xi1> to vector<8x128xi32>
    %267 = arith.sitofp %266 : vector<8x128xi32> to vector<8x128xf32>
    %268 = vector.shape_cast %267 : vector<8x128xf32> to vector<1x8x128xf32>
    %cst_120 = arith.constant dense<0.000000e+00> : vector<1xf32>
    %269 = vector.multi_reduction <add>, %268, %cst_120 [1, 2] : vector<1x8x128xf32> to vector<1xf32>
    %270 = vector.shape_cast %269 : vector<1xf32> to vector<1x1x1xf32>
    %271 = vector.extract %270[0, 0, 0] : f32 from vector<1x1x1xf32>
    %272 = arith.andi %264, %7 : vector<8x128xi1>
    %273 = arith.extui %272 : vector<8x128xi1> to vector<8x128xi32>
    %274 = arith.sitofp %273 : vector<8x128xi32> to vector<8x128xf32>
    %275 = vector.shape_cast %274 : vector<8x128xf32> to vector<1x8x128xf32>
    %cst_121 = arith.constant dense<0.000000e+00> : vector<1xf32>
    %276 = vector.multi_reduction <add>, %275, %cst_121 [1, 2] : vector<1x8x128xf32> to vector<1xf32>
    %277 = vector.shape_cast %276 : vector<1xf32> to vector<1x1x1xf32>
    %278 = vector.extract %277[0, 0, 0] : f32 from vector<1x1x1xf32>
    %cst_122 = arith.constant 4.000000e+00 : f32
    %279 = arith.cmpf olt, %278, %cst_122 : f32
    %cst_123 = arith.constant 4.000000e+00 : f32
    %280 = arith.cmpf ogt, %271, %cst_123 : f32
    %281 = arith.andi %279, %280 : i1
    %cst_124 = arith.constant 4.000000e+00 : f32
    %282 = arith.cmpf ogt, %278, %cst_124 : f32
    %cst_125 = arith.constant 4.000000e+00 : f32
    %283 = arith.cmpf olt, %271, %cst_125 : f32
    %284 = arith.andi %282, %283 : i1
    %285 = arith.mulf %254, %255 : vector<8x128xf32>
    %286 = arith.select %284, %255, %285 : vector<8x128xf32>
    %287 = arith.select %281, %254, %286 : vector<8x128xf32>
    %c0_126 = arith.constant 0 : index
    %c0_127 = arith.constant 0 : index
    %288 = vector.load %arg6[%c0_126, %c0_127] : memref<8x128xf32, #tpu.memory_space<vmem>>, vector<8x128xf32>
    %289 = arith.mulf %261, %288 : vector<8x128xf32>
    %290 = arith.addf %289, %287 : vector<8x128xf32>
    %291 = math.tanh %290 : vector<8x128xf32>
    %292 = arith.mulf %262, %291 : vector<8x128xf32>
    %c0_128 = arith.constant 0 : index
    %c0_129 = arith.constant 0 : index
    %293 = vector.load %arg7[%c0_128, %c0_129] : memref<8x128xf32, #tpu.memory_space<vmem>>, vector<8x128xf32>
    tpu.vector_store %arg7[%c0_128, %c0_129], %292 {strides = array<i32>} : memref<8x128xf32, #tpu.memory_space<vmem>>, vector<8x128xf32>,
    %c0_130 = arith.constant 0 : index
    %c0_131 = arith.constant 0 : index
    %294 = vector.load %arg6[%c0_130, %c0_131] : memref<8x128xf32, #tpu.memory_space<vmem>>, vector<8x128xf32>
    tpu.vector_store %arg6[%c0_130, %c0_131], %290 {strides = array<i32>} : memref<8x128xf32, #tpu.memory_space<vmem>>, vector<8x128xf32>,
    %c4_132 = arith.constant 4 : index
    %c0_133 = arith.constant 0 : index
    %c0_134 = arith.constant 0 : index
    %295 = vector.load %arg5[%c4_132, %c0_133, %c0_134] : memref<8x8x128xf32, #tpu.memory_space<vmem>>, vector<1x8x128xf32>
    %296 = vector.shape_cast %295 : vector<1x8x128xf32> to vector<8x128xf32>
    %297 = vector.shape_cast %292 : vector<8x128xf32> to vector<1x8x128xf32>
    tpu.vector_store %arg5[%c4_132, %c0_133, %c0_134], %297 {strides = array<i32>} : memref<8x8x128xf32, #tpu.memory_space<vmem>>, vector<1x8x128xf32>,
    %c0_135 = arith.constant 0 : index
    %c0_136 = arith.constant 0 : index
    %298 = vector.load %arg7[%c0_135, %c0_136] : memref<8x128xf32, #tpu.memory_space<vmem>>, vector<8x128xf32>
    %299 = arith.truncf %298 : vector<8x128xf32> to vector<8x128xbf16>
    %c5 = arith.constant 5 : index
    %c0_137 = arith.constant 0 : index
    %c0_138 = arith.constant 0 : index
    %300 = vector.load %arg1[%c5, %c0_137, %c0_138] : memref<8x8x384xf32, #tpu.memory_space<vmem>>, vector<1x8x384xf32>
    %301 = vector.shape_cast %300 : vector<1x8x384xf32> to vector<8x384xf32>
    %c0_139 = arith.constant 0 : index
    %c0_140 = arith.constant 0 : index
    %302 = vector.load %arg2[%c0_139, %c0_140] : memref<128x384xbf16, #tpu.memory_space<vmem>>, vector<128x384xbf16>
    %cst_141 = arith.constant dense<0.000000e+00> : vector<8x384xf32>
    %303 = tpu.matmul %299, %302, %cst_141 {dimension_numbers = #tpu.dot_dimension_numbers<[1], [0], [0], [1], [0, 0, 1, 1], [], []>} : vector<8x128xbf16>, vector<128x384xbf16>, vector<8x384xf32> -> vector<8x384xf32>
    %304 = arith.addf %301, %303 : vector<8x384xf32>
    %305 = vector.extract_strided_slice %304 {offsets = [0, 0], sizes = [8, 128], strides = [1, 1]} : vector<8x384xf32> to vector<8x128xf32>
    %306 = vector.extract_strided_slice %304 {offsets = [0, 128], sizes = [8, 128], strides = [1, 1]} : vector<8x384xf32> to vector<8x128xf32>
    %307 = vector.extract_strided_slice %304 {offsets = [0, 256], sizes = [8, 128], strides = [1, 1]} : vector<8x384xf32> to vector<8x128xf32>
    %308 = arith.negf %305 : vector<8x128xf32>
    %309 = math.exp %308 : vector<8x128xf32>
    %cst_142 = arith.constant 1.000000e+00 : f32
    %310 = vector.broadcast %cst_142 : f32 to vector<8x128xf32>
    %311 = arith.addf %310, %309 : vector<8x128xf32>
    %312 = arith.divf %310, %311 : vector<8x128xf32>
    %313 = math.tanh %306 : vector<8x128xf32>
    %314 = arith.negf %306 : vector<8x128xf32>
    %315 = math.exp %314 : vector<8x128xf32>
    %cst_143 = arith.constant 1.000000e+00 : f32
    %316 = vector.broadcast %cst_143 : f32 to vector<8x128xf32>
    %317 = arith.addf %316, %315 : vector<8x128xf32>
    %318 = arith.divf %316, %317 : vector<8x128xf32>
    %c64_i32_144 = arith.constant 64 : i32
    %319 = tpu.dynamic_rotate %312 by %c64_i32_144 dim 1 : vector<8x128xf32>, i32 -> vector<8x128xf32>
    %c64_i32_145 = arith.constant 64 : i32
    %320 = tpu.dynamic_rotate %318 by %c64_i32_145 dim 1 : vector<8x128xf32>, i32 -> vector<8x128xf32>
    %cst_146 = arith.constant 0.000000e+00 : f32
    %321 = vector.broadcast %cst_146 : f32 to vector<8x128xf32>
    %322 = arith.cmpf ogt, %307, %321 : vector<8x128xf32>
    %323 = arith.andi %322, %5 : vector<8x128xi1>
    %324 = arith.extui %323 : vector<8x128xi1> to vector<8x128xi32>
    %325 = arith.sitofp %324 : vector<8x128xi32> to vector<8x128xf32>
    %326 = vector.shape_cast %325 : vector<8x128xf32> to vector<1x8x128xf32>
    %cst_147 = arith.constant dense<0.000000e+00> : vector<1xf32>
    %327 = vector.multi_reduction <add>, %326, %cst_147 [1, 2] : vector<1x8x128xf32> to vector<1xf32>
    %328 = vector.shape_cast %327 : vector<1xf32> to vector<1x1x1xf32>
    %329 = vector.extract %328[0, 0, 0] : f32 from vector<1x1x1xf32>
    %330 = arith.andi %322, %7 : vector<8x128xi1>
    %331 = arith.extui %330 : vector<8x128xi1> to vector<8x128xi32>
    %332 = arith.sitofp %331 : vector<8x128xi32> to vector<8x128xf32>
    %333 = vector.shape_cast %332 : vector<8x128xf32> to vector<1x8x128xf32>
    %cst_148 = arith.constant dense<0.000000e+00> : vector<1xf32>
    %334 = vector.multi_reduction <add>, %333, %cst_148 [1, 2] : vector<1x8x128xf32> to vector<1xf32>
    %335 = vector.shape_cast %334 : vector<1xf32> to vector<1x1x1xf32>
    %336 = vector.extract %335[0, 0, 0] : f32 from vector<1x1x1xf32>
    %cst_149 = arith.constant 4.000000e+00 : f32
    %337 = arith.cmpf olt, %336, %cst_149 : f32
    %cst_150 = arith.constant 4.000000e+00 : f32
    %338 = arith.cmpf ogt, %329, %cst_150 : f32
    %339 = arith.andi %337, %338 : i1
    %cst_151 = arith.constant 4.000000e+00 : f32
    %340 = arith.cmpf ogt, %336, %cst_151 : f32
    %cst_152 = arith.constant 4.000000e+00 : f32
    %341 = arith.cmpf olt, %329, %cst_152 : f32
    %342 = arith.andi %340, %341 : i1
    %343 = arith.mulf %312, %313 : vector<8x128xf32>
    %344 = arith.select %342, %313, %343 : vector<8x128xf32>
    %345 = arith.select %339, %312, %344 : vector<8x128xf32>
    %c0_153 = arith.constant 0 : index
    %c0_154 = arith.constant 0 : index
    %346 = vector.load %arg6[%c0_153, %c0_154] : memref<8x128xf32, #tpu.memory_space<vmem>>, vector<8x128xf32>
    %347 = arith.mulf %319, %346 : vector<8x128xf32>
    %348 = arith.addf %347, %345 : vector<8x128xf32>
    %349 = math.tanh %348 : vector<8x128xf32>
    %350 = arith.mulf %320, %349 : vector<8x128xf32>
    %c0_155 = arith.constant 0 : index
    %c0_156 = arith.constant 0 : index
    %351 = vector.load %arg7[%c0_155, %c0_156] : memref<8x128xf32, #tpu.memory_space<vmem>>, vector<8x128xf32>
    tpu.vector_store %arg7[%c0_155, %c0_156], %350 {strides = array<i32>} : memref<8x128xf32, #tpu.memory_space<vmem>>, vector<8x128xf32>,
    %c0_157 = arith.constant 0 : index
    %c0_158 = arith.constant 0 : index
    %352 = vector.load %arg6[%c0_157, %c0_158] : memref<8x128xf32, #tpu.memory_space<vmem>>, vector<8x128xf32>
    tpu.vector_store %arg6[%c0_157, %c0_158], %348 {strides = array<i32>} : memref<8x128xf32, #tpu.memory_space<vmem>>, vector<8x128xf32>,
    %c5_159 = arith.constant 5 : index
    %c0_160 = arith.constant 0 : index
    %c0_161 = arith.constant 0 : index
    %353 = vector.load %arg5[%c5_159, %c0_160, %c0_161] : memref<8x8x128xf32, #tpu.memory_space<vmem>>, vector<1x8x128xf32>
    %354 = vector.shape_cast %353 : vector<1x8x128xf32> to vector<8x128xf32>
    %355 = vector.shape_cast %350 : vector<8x128xf32> to vector<1x8x128xf32>
    tpu.vector_store %arg5[%c5_159, %c0_160, %c0_161], %355 {strides = array<i32>} : memref<8x8x128xf32, #tpu.memory_space<vmem>>, vector<1x8x128xf32>,
    %c0_162 = arith.constant 0 : index
    %c0_163 = arith.constant 0 : index
    %356 = vector.load %arg7[%c0_162, %c0_163] : memref<8x128xf32, #tpu.memory_space<vmem>>, vector<8x128xf32>
    %357 = arith.truncf %356 : vector<8x128xf32> to vector<8x128xbf16>
    %c6 = arith.constant 6 : index
    %c0_164 = arith.constant 0 : index
    %c0_165 = arith.constant 0 : index
    %358 = vector.load %arg1[%c6, %c0_164, %c0_165] : memref<8x8x384xf32, #tpu.memory_space<vmem>>, vector<1x8x384xf32>
    %359 = vector.shape_cast %358 : vector<1x8x384xf32> to vector<8x384xf32>
    %c0_166 = arith.constant 0 : index
    %c0_167 = arith.constant 0 : index
    %360 = vector.load %arg2[%c0_166, %c0_167] : memref<128x384xbf16, #tpu.memory_space<vmem>>, vector<128x384xbf16>
    %cst_168 = arith.constant dense<0.000000e+00> : vector<8x384xf32>
    %361 = tpu.matmul %357, %360, %cst_168 {dimension_numbers = #tpu.dot_dimension_numbers<[1], [0], [0], [1], [0, 0, 1, 1], [], []>} : vector<8x128xbf16>, vector<128x384xbf16>, vector<8x384xf32> -> vector<8x384xf32>
    %362 = arith.addf %359, %361 : vector<8x384xf32>
    %363 = vector.extract_strided_slice %362 {offsets = [0, 0], sizes = [8, 128], strides = [1, 1]} : vector<8x384xf32> to vector<8x128xf32>
    %364 = vector.extract_strided_slice %362 {offsets = [0, 128], sizes = [8, 128], strides = [1, 1]} : vector<8x384xf32> to vector<8x128xf32>
    %365 = vector.extract_strided_slice %362 {offsets = [0, 256], sizes = [8, 128], strides = [1, 1]} : vector<8x384xf32> to vector<8x128xf32>
    %366 = arith.negf %363 : vector<8x128xf32>
    %367 = math.exp %366 : vector<8x128xf32>
    %cst_169 = arith.constant 1.000000e+00 : f32
    %368 = vector.broadcast %cst_169 : f32 to vector<8x128xf32>
    %369 = arith.addf %368, %367 : vector<8x128xf32>
    %370 = arith.divf %368, %369 : vector<8x128xf32>
    %371 = math.tanh %364 : vector<8x128xf32>
    %372 = arith.negf %364 : vector<8x128xf32>
    %373 = math.exp %372 : vector<8x128xf32>
    %cst_170 = arith.constant 1.000000e+00 : f32
    %374 = vector.broadcast %cst_170 : f32 to vector<8x128xf32>
    %375 = arith.addf %374, %373 : vector<8x128xf32>
    %376 = arith.divf %374, %375 : vector<8x128xf32>
    %c64_i32_171 = arith.constant 64 : i32
    %377 = tpu.dynamic_rotate %370 by %c64_i32_171 dim 1 : vector<8x128xf32>, i32 -> vector<8x128xf32>
    %c64_i32_172 = arith.constant 64 : i32
    %378 = tpu.dynamic_rotate %376 by %c64_i32_172 dim 1 : vector<8x128xf32>, i32 -> vector<8x128xf32>
    %cst_173 = arith.constant 0.000000e+00 : f32
    %379 = vector.broadcast %cst_173 : f32 to vector<8x128xf32>
    %380 = arith.cmpf ogt, %365, %379 : vector<8x128xf32>
    %381 = arith.andi %380, %5 : vector<8x128xi1>
    %382 = arith.extui %381 : vector<8x128xi1> to vector<8x128xi32>
    %383 = arith.sitofp %382 : vector<8x128xi32> to vector<8x128xf32>
    %384 = vector.shape_cast %383 : vector<8x128xf32> to vector<1x8x128xf32>
    %cst_174 = arith.constant dense<0.000000e+00> : vector<1xf32>
    %385 = vector.multi_reduction <add>, %384, %cst_174 [1, 2] : vector<1x8x128xf32> to vector<1xf32>
    %386 = vector.shape_cast %385 : vector<1xf32> to vector<1x1x1xf32>
    %387 = vector.extract %386[0, 0, 0] : f32 from vector<1x1x1xf32>
    %388 = arith.andi %380, %7 : vector<8x128xi1>
    %389 = arith.extui %388 : vector<8x128xi1> to vector<8x128xi32>
    %390 = arith.sitofp %389 : vector<8x128xi32> to vector<8x128xf32>
    %391 = vector.shape_cast %390 : vector<8x128xf32> to vector<1x8x128xf32>
    %cst_175 = arith.constant dense<0.000000e+00> : vector<1xf32>
    %392 = vector.multi_reduction <add>, %391, %cst_175 [1, 2] : vector<1x8x128xf32> to vector<1xf32>
    %393 = vector.shape_cast %392 : vector<1xf32> to vector<1x1x1xf32>
    %394 = vector.extract %393[0, 0, 0] : f32 from vector<1x1x1xf32>
    %cst_176 = arith.constant 4.000000e+00 : f32
    %395 = arith.cmpf olt, %394, %cst_176 : f32
    %cst_177 = arith.constant 4.000000e+00 : f32
    %396 = arith.cmpf ogt, %387, %cst_177 : f32
    %397 = arith.andi %395, %396 : i1
    %cst_178 = arith.constant 4.000000e+00 : f32
    %398 = arith.cmpf ogt, %394, %cst_178 : f32
    %cst_179 = arith.constant 4.000000e+00 : f32
    %399 = arith.cmpf olt, %387, %cst_179 : f32
    %400 = arith.andi %398, %399 : i1
    %401 = arith.mulf %370, %371 : vector<8x128xf32>
    %402 = arith.select %400, %371, %401 : vector<8x128xf32>
    %403 = arith.select %397, %370, %402 : vector<8x128xf32>
    %c0_180 = arith.constant 0 : index
    %c0_181 = arith.constant 0 : index
    %404 = vector.load %arg6[%c0_180, %c0_181] : memref<8x128xf32, #tpu.memory_space<vmem>>, vector<8x128xf32>
    %405 = arith.mulf %377, %404 : vector<8x128xf32>
    %406 = arith.addf %405, %403 : vector<8x128xf32>
    %407 = math.tanh %406 : vector<8x128xf32>
    %408 = arith.mulf %378, %407 : vector<8x128xf32>
    %c0_182 = arith.constant 0 : index
    %c0_183 = arith.constant 0 : index
    %409 = vector.load %arg7[%c0_182, %c0_183] : memref<8x128xf32, #tpu.memory_space<vmem>>, vector<8x128xf32>
    tpu.vector_store %arg7[%c0_182, %c0_183], %408 {strides = array<i32>} : memref<8x128xf32, #tpu.memory_space<vmem>>, vector<8x128xf32>,
    %c0_184 = arith.constant 0 : index
    %c0_185 = arith.constant 0 : index
    %410 = vector.load %arg6[%c0_184, %c0_185] : memref<8x128xf32, #tpu.memory_space<vmem>>, vector<8x128xf32>
    tpu.vector_store %arg6[%c0_184, %c0_185], %406 {strides = array<i32>} : memref<8x128xf32, #tpu.memory_space<vmem>>, vector<8x128xf32>,
    %c6_186 = arith.constant 6 : index
    %c0_187 = arith.constant 0 : index
    %c0_188 = arith.constant 0 : index
    %411 = vector.load %arg5[%c6_186, %c0_187, %c0_188] : memref<8x8x128xf32, #tpu.memory_space<vmem>>, vector<1x8x128xf32>
    %412 = vector.shape_cast %411 : vector<1x8x128xf32> to vector<8x128xf32>
    %413 = vector.shape_cast %408 : vector<8x128xf32> to vector<1x8x128xf32>
    tpu.vector_store %arg5[%c6_186, %c0_187, %c0_188], %413 {strides = array<i32>} : memref<8x8x128xf32, #tpu.memory_space<vmem>>, vector<1x8x128xf32>,
    %c0_189 = arith.constant 0 : index
    %c0_190 = arith.constant 0 : index
    %414 = vector.load %arg7[%c0_189, %c0_190] : memref<8x128xf32, #tpu.memory_space<vmem>>, vector<8x128xf32>
    %415 = arith.truncf %414 : vector<8x128xf32> to vector<8x128xbf16>
    %c7 = arith.constant 7 : index
    %c0_191 = arith.constant 0 : index
    %c0_192 = arith.constant 0 : index
    %416 = vector.load %arg1[%c7, %c0_191, %c0_192] : memref<8x8x384xf32, #tpu.memory_space<vmem>>, vector<1x8x384xf32>
    %417 = vector.shape_cast %416 : vector<1x8x384xf32> to vector<8x384xf32>
    %c0_193 = arith.constant 0 : index
    %c0_194 = arith.constant 0 : index
    %418 = vector.load %arg2[%c0_193, %c0_194] : memref<128x384xbf16, #tpu.memory_space<vmem>>, vector<128x384xbf16>
    %cst_195 = arith.constant dense<0.000000e+00> : vector<8x384xf32>
    %419 = tpu.matmul %415, %418, %cst_195 {dimension_numbers = #tpu.dot_dimension_numbers<[1], [0], [0], [1], [0, 0, 1, 1], [], []>} : vector<8x128xbf16>, vector<128x384xbf16>, vector<8x384xf32> -> vector<8x384xf32>
    %420 = arith.addf %417, %419 : vector<8x384xf32>
    %421 = vector.extract_strided_slice %420 {offsets = [0, 0], sizes = [8, 128], strides = [1, 1]} : vector<8x384xf32> to vector<8x128xf32>
    %422 = vector.extract_strided_slice %420 {offsets = [0, 128], sizes = [8, 128], strides = [1, 1]} : vector<8x384xf32> to vector<8x128xf32>
    %423 = vector.extract_strided_slice %420 {offsets = [0, 256], sizes = [8, 128], strides = [1, 1]} : vector<8x384xf32> to vector<8x128xf32>
    %424 = arith.negf %421 : vector<8x128xf32>
    %425 = math.exp %424 : vector<8x128xf32>
    %cst_196 = arith.constant 1.000000e+00 : f32
    %426 = vector.broadcast %cst_196 : f32 to vector<8x128xf32>
    %427 = arith.addf %426, %425 : vector<8x128xf32>
    %428 = arith.divf %426, %427 : vector<8x128xf32>
    %429 = math.tanh %422 : vector<8x128xf32>
    %430 = arith.negf %422 : vector<8x128xf32>
    %431 = math.exp %430 : vector<8x128xf32>
    %cst_197 = arith.constant 1.000000e+00 : f32
    %432 = vector.broadcast %cst_197 : f32 to vector<8x128xf32>
    %433 = arith.addf %432, %431 : vector<8x128xf32>
    %434 = arith.divf %432, %433 : vector<8x128xf32>
    %c64_i32_198 = arith.constant 64 : i32
    %435 = tpu.dynamic_rotate %428 by %c64_i32_198 dim 1 : vector<8x128xf32>, i32 -> vector<8x128xf32>
    %c64_i32_199 = arith.constant 64 : i32
    %436 = tpu.dynamic_rotate %434 by %c64_i32_199 dim 1 : vector<8x128xf32>, i32 -> vector<8x128xf32>
    %cst_200 = arith.constant 0.000000e+00 : f32
    %437 = vector.broadcast %cst_200 : f32 to vector<8x128xf32>
    %438 = arith.cmpf ogt, %423, %437 : vector<8x128xf32>
    %439 = arith.andi %438, %5 : vector<8x128xi1>
    %440 = arith.extui %439 : vector<8x128xi1> to vector<8x128xi32>
    %441 = arith.sitofp %440 : vector<8x128xi32> to vector<8x128xf32>
    %442 = vector.shape_cast %441 : vector<8x128xf32> to vector<1x8x128xf32>
    %cst_201 = arith.constant dense<0.000000e+00> : vector<1xf32>
    %443 = vector.multi_reduction <add>, %442, %cst_201 [1, 2] : vector<1x8x128xf32> to vector<1xf32>
    %444 = vector.shape_cast %443 : vector<1xf32> to vector<1x1x1xf32>
    %445 = vector.extract %444[0, 0, 0] : f32 from vector<1x1x1xf32>
    %446 = arith.andi %438, %7 : vector<8x128xi1>
    %447 = arith.extui %446 : vector<8x128xi1> to vector<8x128xi32>
    %448 = arith.sitofp %447 : vector<8x128xi32> to vector<8x128xf32>
    %449 = vector.shape_cast %448 : vector<8x128xf32> to vector<1x8x128xf32>
    %cst_202 = arith.constant dense<0.000000e+00> : vector<1xf32>
    %450 = vector.multi_reduction <add>, %449, %cst_202 [1, 2] : vector<1x8x128xf32> to vector<1xf32>
    %451 = vector.shape_cast %450 : vector<1xf32> to vector<1x1x1xf32>
    %452 = vector.extract %451[0, 0, 0] : f32 from vector<1x1x1xf32>
    %cst_203 = arith.constant 4.000000e+00 : f32
    %453 = arith.cmpf olt, %452, %cst_203 : f32
    %cst_204 = arith.constant 4.000000e+00 : f32
    %454 = arith.cmpf ogt, %445, %cst_204 : f32
    %455 = arith.andi %453, %454 : i1
    %cst_205 = arith.constant 4.000000e+00 : f32
    %456 = arith.cmpf ogt, %452, %cst_205 : f32
    %cst_206 = arith.constant 4.000000e+00 : f32
    %457 = arith.cmpf olt, %445, %cst_206 : f32
    %458 = arith.andi %456, %457 : i1
    %459 = arith.mulf %428, %429 : vector<8x128xf32>
    %460 = arith.select %458, %429, %459 : vector<8x128xf32>
    %461 = arith.select %455, %428, %460 : vector<8x128xf32>
    %c0_207 = arith.constant 0 : index
    %c0_208 = arith.constant 0 : index
    %462 = vector.load %arg6[%c0_207, %c0_208] : memref<8x128xf32, #tpu.memory_space<vmem>>, vector<8x128xf32>
    %463 = arith.mulf %435, %462 : vector<8x128xf32>
    %464 = arith.addf %463, %461 : vector<8x128xf32>
    %465 = math.tanh %464 : vector<8x128xf32>
    %466 = arith.mulf %436, %465 : vector<8x128xf32>
    %c0_209 = arith.constant 0 : index
    %c0_210 = arith.constant 0 : index
    %467 = vector.load %arg7[%c0_209, %c0_210] : memref<8x128xf32, #tpu.memory_space<vmem>>, vector<8x128xf32>
    tpu.vector_store %arg7[%c0_209, %c0_210], %466 {strides = array<i32>} : memref<8x128xf32, #tpu.memory_space<vmem>>, vector<8x128xf32>,
    %c0_211 = arith.constant 0 : index
    %c0_212 = arith.constant 0 : index
    %468 = vector.load %arg6[%c0_211, %c0_212] : memref<8x128xf32, #tpu.memory_space<vmem>>, vector<8x128xf32>
    tpu.vector_store %arg6[%c0_211, %c0_212], %464 {strides = array<i32>} : memref<8x128xf32, #tpu.memory_space<vmem>>, vector<8x128xf32>,
    %c7_213 = arith.constant 7 : index
    %c0_214 = arith.constant 0 : index
    %c0_215 = arith.constant 0 : index
    %469 = vector.load %arg5[%c7_213, %c0_214, %c0_215] : memref<8x8x128xf32, #tpu.memory_space<vmem>>, vector<1x8x128xf32>
    %470 = vector.shape_cast %469 : vector<1x8x128xf32> to vector<8x128xf32>
    %471 = vector.shape_cast %466 : vector<8x128xf32> to vector<1x8x128xf32>
    tpu.vector_store %arg5[%c7_213, %c0_214, %c0_215], %471 {strides = array<i32>} : memref<8x8x128xf32, #tpu.memory_space<vmem>>, vector<1x8x128xf32>,
    return
  }
  func.func @transform_0(%arg0: i32) -> (i32, i32, i32) {
    %c0_i32 = arith.constant 0 : i32
    %c0_i32_0 = arith.constant 0 : i32
    %c0_i32_1 = arith.constant 0 : i32
    return %arg0, %c0_i32, %c0_i32_0 : i32, i32, i32
  }
  func.func @transform_1(%arg0: i32) -> (i32, i32) {
    %c0_i32 = arith.constant 0 : i32
    %c0_i32_0 = arith.constant 0 : i32
    %c0_i32_1 = arith.constant 0 : i32
    return %c0_i32, %c0_i32_0 : i32, i32
  }
  func.func @transform_2(%arg0: i32) -> (i32, i32) {
    %c0_i32 = arith.constant 0 : i32
    %c0_i32_0 = arith.constant 0 : i32
    %c0_i32_1 = arith.constant 0 : i32
    return %c0_i32, %c0_i32_0 : i32, i32
  }
  func.func @transform_3(%arg0: i32) -> (i32, i32) {
    %c0_i32 = arith.constant 0 : i32
    %c0_i32_0 = arith.constant 0 : i32
    %c0_i32_1 = arith.constant 0 : i32
    return %c0_i32, %c0_i32_0 : i32, i32
  }
  func.func @transform_4(%arg0: i32) -> (i32, i32, i32) {
    %c0_i32 = arith.constant 0 : i32
    %c0_i32_0 = arith.constant 0 : i32
    %c0_i32_1 = arith.constant 0 : i32
    return %arg0, %c0_i32, %c0_i32_0 : i32, i32, i32
  }
  func.func @transform_5(%arg0: i32) -> (i32, i32) {
    %c0_i32 = arith.constant 0 : i32
    %c0_i32_0 = arith.constant 0 : i32
    %c0_i32_1 = arith.constant 0 : i32
    return %c0_i32, %c0_i32_0 : i32, i32
  }
}

</mosaic_0001>

<bundles_post_ra>
// kernel: tpu_custom_call.1
= control target key start
LH: loop header
LB: loop body
LE: loop exit
PB: predicated region body
PF: predicated region fallthrough
CT: control target
= control target key end

     0   :  { %11 = vsyncpa [#allocation4], 0  ;;  %s4771_s0 = inlined_call_operand.hbm [shape: f32[16,8,384], index: 0, kind: input, shape index: {}]   ;;  %s4772_s1 = inlined_call_operand.hbm [shape: bf16[128,384], index: 1, kind: input, shape index: {}]   ;;  %s4773_s2 = inlined_call_operand.hbm [shape: f32[8,128], index: 2, kind: input, shape index: {}]   ;;  %s4774_s3 = inlined_call_operand.vmem [shape: f32[8,128], index: 3, kind: input, shape index: {}]   ;;  %s4775_s4 = inlined_call_operand.hbm [shape: f32[16,8,128], index: 4, kind: output, shape index: {0}]   ;;  %s4776_s5 = inlined_call_operand.hbm [shape: f32[8,128], index: 5, kind: output, shape index: {1}]  }
   0x1   :  { %13 = vsyncpa [#allocation4 + $0x1], 0 }
   0x2   :  { %14 = vsyncpa [#allocation7], 0 }
   0x3   :  { %15 = vsyncpa [#allocation5], 0 }
   0x4   :  { %17 = vsyncpa [#allocation5 + $0x1], 0 }
   0x5   :  { %18 = vsyncpa [#allocation11], 0  ;;  %s4036_s18 = smov 0   ;;  %s4038_s19 = smov 0  }
   0x6   :  { %s4040_s20 = smov 0   ;;  %s4042_s21 = smov 0  }
   0x7 LB: > { %s4057_s22 = sadd.s32 4294967295, %s3989_s21   ;;  %s2955_s23 = sadd.s32 4294967294, %s3989_s21   ;;  %s3989_s21 = sphi %s4042_s21, %s4802_s21   ;;  %s3985_s20 = sphi %s4040_s20, %s4801_s20   ;;  %s3981_s19 = sphi %s4038_s19, %s4800_s19   ;;  %s3977_s18 = sphi %s4036_s18, %s4799_s18  }
   0x8   : > { %p44_p0 = scmp.ne.s32.totalorder %s3981_s19, %s3977_s18  ;;  %p4777_p1 = scmp.eq.s32.totalorder %s4057_s22, 0 }
   0x9   : > { %p137_p3 = scmp.eq.s32.totalorder %s2955_s23, 1  ;;  %p2956_p5 = scmp.ge.s32.totalorder %s3989_s21, 1 }
   0xa   : > { %p4066_p4 = por %p4777_p1, %p44_p0  ;;  %p165_p7 = scmp.lt.s32.totalorder %s3989_s21, 3 }
   0xb   : > { %p4071_p6 = por %p137_p3, %p44_p0  ;;  %s3991_s27 = smov [#allocation6]  }
   0xc   : > { %s4780_s24 = scalar_select %p4066_p4, 1, 0 }
   0xd   : > { %s4781_s25 = scalar_select %p4071_p6, 1, 0 }
   0xe   : > { %p4077_p9 = pnand %p2956_p5, %p165_p7  ;;  %s177_s28 = sshll.u32 %s3991_s27, 4  ;;  %s4081_s28 = int_to_ptr.vmem [resolvable:$true] %s177_s28 }
   0xf   : > { %s3992_s30 = smov [#allocation8]   ;;  %s3803_s9 = scalar_lea.hbm %s4772_s1, 3072 }
  0x10   : > { %p3527_p10 = pneg %p4077_p9  ;;  %s191_s6 = sshll.u32 %s3992_s30, 4  ;;  %s4092_s6 = int_to_ptr.vmem [resolvable:$true] %s191_s6 }
  0x11   : > { %p3804_p13 = scmp.ne.s32.totalorder %s4772_s1, %s3803_s9  ;;  %p3810_p7 = scmp.lt.u32.totalorder %s3803_s9, %s4772_s1 }
  0x12   : > { %p4088_p12 = pnand %p3527_p10, %p4777_p1 }
  0x14   : > { %p3805_p0 = pneg %p4088_p12 }
  0x16   : > { %p3806_p3 = pnand %p3805_p0, %p3804_p13 }
  0x18   : > { %p3807_p5 = pneg %p3806_p3 }
  0x1a   : > { %p3812_p10 = pnand %p3810_p7, %p3807_p5 }
  0x1c   : > { %3815 = shalt.err (!%p3812_p10)
}
  0x1d   : > { %s3816_s14 = scalar_lea.vmem %s4081_s28, 3072  ;;  %p3824_p2 = scmp.lt.s32.totalorder %s4081_s28, %s4081_s28 }
  0x1e   : > { %p3817_p11 = scmp.ne.s32.totalorder %s4081_s28, %s3816_s14  ;;  %p3825_p13 = scmp.lt.s32.totalorder %s3816_s14, %s3816_s14 }
  0x20   : > { %p3819_p8 = pnand %p3817_p11, %p3805_p0  ;;  %p3826_p3 = por %p3825_p13, %p3824_p2 }
  0x22   : > { %p3820_p1 = pneg %p3819_p8 }
  0x24   : > { %p3827_p6 = pnand %p3826_p3, %p3820_p1 }
  0x26   : > { %3830 = shalt.err (!%p3827_p6)
}
  0x27   : > { %s3993_s15 = smov 192   ;;  %s3994_s16 = smov 12  }
  0x28   : > { %3530 = dma.hbm_to_vmem [thread:$0]  (!%p4088_p12), %s4772_s1, 3072, %s4081_s28, [#allocation7], %s3993_s15, %s3993_s15, %s3994_s16  }
  0x29   : > { %s3831_s7 = scalar_lea.hbm %s4773_s2, 128 }
  0x2a   : > { %p3832_p2 = scmp.ne.s32.totalorder %s4773_s2, %s3831_s7  ;;  %p3838_p8 = scmp.lt.u32.totalorder %s3831_s7, %s4773_s2 }
  0x2c   : > { %p3834_p1 = pnand %p3832_p2, %p3805_p0 }
  0x2e   : > { %p3835_p6 = pneg %p3834_p1 }
  0x30   : > { %p3840_p11 = pnand %p3838_p8, %p3835_p6 }
  0x32   : > { %3843 = shalt.err (!%p3840_p11)
}
  0x33   : > { %s3844_s28 = scalar_lea.vmem %s4092_s6, 128  ;;  %p3852_p13 = scmp.lt.s32.totalorder %s4092_s6, %s4092_s6 }
  0x34   : > { %p3845_p5 = scmp.ne.s32.totalorder %s4092_s6, %s3844_s28  ;;  %p3853_p3 = scmp.lt.s32.totalorder %s3844_s28, %s3844_s28 }
  0x36   : > { %p3847_p7 = pnand %p3845_p5, %p3805_p0  ;;  %p3854_p2 = por %p3853_p3, %p3852_p13 }
  0x38   : > { %p3848_p10 = pneg %p3847_p7 }
  0x3a   : > { %p3855_p1 = pnand %p3854_p2, %p3848_p10 }
  0x3c   : > { %3858 = shalt.err (!%p3855_p1)
}
  0x3d   : > { %3533 = dma.hbm_to_vmem [thread:$0]  (!%p4088_p12), %s4773_s2, 128, %s4092_s6, [#allocation7]  }
  0x3e   : > { %s4147_s14 = sadd.s32 1, %s3989_s21   ;;  %s31_s29 = sadd.s32 1, %s3985_s20 }
  0x3f   : > { %s28_s15 = ssub.s32 %s3989_s21, %s4147_s14  ;;  %p38_p0 = scmp.ne.s32.totalorder %s3985_s20, %s3981_s19 }
  0x40   : > { %p29_p6 = scmp.eq.s32.totalorder %s28_s15, 0  ;;  %p39_p8 = scmp.eq.s32.totalorder %s3989_s21, 0 }
  0x41   : > { %p4784_p11 = scmp.eq.s32.totalorder %s4057_s22, 1  ;;  %p3544_p7 = scmp.lt.s32.totalorder %s3989_s21, 2 }
  0x42   : > { %s4163_s17 = scalar_select %p29_p6, %s3985_s20, %s31_s29  }
  0x43   : > { %p4157_p5 = por %p4784_p11, %p38_p0  ;;  %p40_p10 = por %p39_p8, %p38_p0 }
  0x44   : > { %s205_s23 = sand.u32 1, %s3985_s20   ;;  %s3477_s6 = smul.u32 3072, %s3989_s21 }
  0x45   : > { %s4785_s16 = scalar_select %p4157_p5, 1, 0 }
  0x46   : > { %s3476_s27 = smul.u32 192, %s205_s23  ;;  %p4167_p12 = pnand %p3544_p7, %p40_p10 }
  0x47   : > { %s4174_s9 = scalar_lea.hbm %s4771_s0, %s3477_s6  ;;  %s4178_s28 = scalar_lea.sflag [#allocation4], %s205_s23 }
  0x48   : > { %s209_s10 = scalar_lea.vmem [#allocation3], %s3476_s27  ;;  %s3859_s12 = scalar_lea.hbm %s4174_s9, 3072 }
  0x49   : > { %s217_s11 = sshll.u32 %s209_s10, 4  ;;  %p3860_p13 = scmp.ne.s32.totalorder %s4174_s9, %s3859_s12  ;;  %s4176_s11 = int_to_ptr.vmem [resolvable:$true] %s217_s11 }
  0x4a   : > { %p3861_p3 = pneg %p4167_p12  ;;  %s3864_s15 = scalar_lea.hbm %s4771_s0, 6144 }
  0x4b   : > { %p3865_p0 = scmp.lt.u32.totalorder %s4174_s9, %s4771_s0  ;;  %p3866_p6 = scmp.lt.u32.totalorder %s3864_s15, %s3859_s12 }
  0x4c   : > { %p3862_p2 = pnand %p3861_p3, %p3860_p13  ;;  %p3868_p11 = scmp.lt.u32.totalorder %s3859_s12, %s4174_s9 }
  0x4d   : > { %p3867_p8 = por %p3866_p6, %p3865_p0 }
  0x4e   : > { %p3863_p1 = pneg %p3862_p2 }
  0x4f   : > { %p3869_p7 = por %p3868_p11, %p3867_p8 }
  0x51   : > { %p3870_p10 = pnand %p3869_p7, %p3863_p1 }
  0x53   : > { %3873 = shalt.err (!%p3870_p10)
}
  0x54   : > { %s3874_s23 = scalar_lea.vmem %s4176_s11, 3072  ;;  %s3995_s27 = smov [#allocation3]  }
  0x55   : > { %p3875_p13 = scmp.ne.s32.totalorder %s4176_s11, %s3874_s23  ;;  %s3879_s8 = sshll.u32 %s3995_s27, 4  ;;  %s3880_s8 = int_to_ptr.vmem [resolvable:$false] %s3879_s8 }
  0x56   : > { %s3881_s10 = scalar_lea.vmem %s3880_s8, 6144  ;;  %p3882_p4 = scmp.lt.s32.totalorder %s4176_s11, %s3880_s8 }
  0x57   : > { %p3877_p2 = pnand %p3875_p13, %p3861_p3  ;;  %p3883_p0 = scmp.lt.s32.totalorder %s3881_s10, %s3874_s23 }
  0x59   : > { %p3878_p5 = pneg %p3877_p2  ;;  %p3884_p6 = por %p3883_p0, %p3882_p4 }
  0x5b   : > { %p3885_p8 = pnand %p3884_p6, %p3878_p5 }
  0x5d   : > { %3888 = shalt.err (!%p3885_p8)
}
  0x5e   : > { %s3996_s12 = smov 384   ;;  %s3997_s13 = smov 24  }
  0x5f   : > { %3537 = dma.hbm_to_vmem [thread:$0]  (!%p4167_p12), %s4174_s9, 3072, %s4176_s11, %s4178_s28, %s3996_s12, %s3996_s12, %s3997_s13  }
  0x60   : > { %229 = sbr.rel (%p4077_p9) target bundleno = 3788 (0xecc), region = 36  ;;  %s4209_s29 = sand.u32 (!%p4077_p9), 1, %s3981_s19  }
  0x61   : > { %s3478_s15 = smul.u32 (!%p4077_p9), 192, %s4209_s29  ;;  %s232_s6 = scalar_lea.sflag (!%p4077_p9), [#allocation4], %s4209_s29 }
  0x62   : > { %p4787_p4 = scmp.ne.s32.totalorder (!%p4077_p9), %s4780_s24, 0 }
  0x63   : > { %s4213_s7 = scalar_lea.vmem (!%p4077_p9), [#allocation3], %s3478_s15 }
  0x67   : > { %3960 = dma.done.wait (%p4787_p4), %s232_s6, 3072  }
  0x68   : > { %3962 = vsyncadd (%p4787_p4), %s232_s6, 4294964224  ;;  %p4788_p5 = scmp.eq.s32.totalorder %s4057_s22, 0 }
  0x6a   : > { %3964 = dma.done.wait (%p4788_p5), [#allocation7], 3200   ;;  %p4789_p9 = pmov %p4788_p5 }
  0x6b   : > { %s2966_s26 = sshll.u32 %s4209_s29, 6  ;;  %p4790_p12 = scmp.ne.s32.totalorder %s4057_s22, 0 }
  0x6c   : > { %3966 = vsyncadd (%p4789_p9), [#allocation7], 4294964096  ;;  %s4224_s30 = scalar_lea.vmem [#allocation9], %s2966_s26  ;;  %v277_v0 = vld [vmem:[#allocation8] sm:$0xff] (!%p4790_p12)  ;;  %v279_v1 = vld [vmem:[%s4774_s3] sm:$0xff] (!%p4790_p12) }
  0x6d   : > { %276 = sbr.rel (%p4790_p12) target bundleno = 116 (0x74), region = 52  ;;  %278 = vst [vmem:[#allocation2] sm:$0xff] (!%p4790_p12), %v277_v0  ;;  %280 = vst [vmem:[#allocation10] sm:$0xff] (!%p4790_p12), %v279_v1 }
  0x74 PF: > { %v3998_v2 = vmov 0.0   ;;  %v3595_v3 = vld [vmem:[#allocation6 + $0x8] ss:$12 sps:$4 sm:$0xff]   ;;  %vm3999_vm0 = vmmov 0   ;;  %v3596_v4 = vld [vmem:[#allocation6 + $0x20] ss:$12 sps:$4 sm:$0xff]   ;;  %v281_v30 = vlaneseq }
  0x75   : > { %3316 = vmatprep.subr.bf16.mxu1 %v3998_v2  ;;  %3332 = vmatprep.mubr.msk.bf16.mxu1 %vm3999_vm0, %v3998_v2  ;;  %v3597_v5 = vld [vmem:[#allocation6 + $0x38] ss:$12 sps:$4 sm:$0xff]   ;;  %v4238_v7 = vld [vmem:[#allocation6] ss:$12 sps:$4 sm:$0xff]   ;;  %v4000_v8 = vmov 0   ;;  %v289_v32 = vld [vmem:[%s4213_s7 + $0x10] sm:$0xff] }
  0x76   : > { %3317 = vmatpush3.bf16.msra.mxu1 %v3595_v3  ;;  %v4236_v6 = vld [vmem:[#allocation6 + $0x4] ss:$12 sps:$4 sm:$0xff]   ;;  %482 = vmatprep.mubr.bf16.mxu0 %v4000_v8  ;;  %v4241_v9 = vld [vmem:[#allocation6 + $0x1c] ss:$12 sps:$4 sm:$0xff]   ;;  %v4249_v12 = vld [vmem:[#allocation6 + $0x34] ss:$12 sps:$4 sm:$0xff]  }
  0x77   : > { %3318 = vmatprep.subr.bf16.mxu1 %v3998_v2  ;;  %v3598_v10 = vld [vmem:[#allocation6 + $0x50] ss:$12 sps:$4 sm:$0xff]   ;;  %450 = vmatprep.subr.bf16.mxu0 %v4236_v6  ;;  %v4246_v11 = vld [vmem:[#allocation6 + $0x18] ss:$12 sps:$4 sm:$0xff]   ;;  %v3599_v13 = vld [vmem:[#allocation6 + $0x68] ss:$12 sps:$4 sm:$0xff]  }
  0x78   : > { %451 = vmatpush1.bf16.msra.mxu0 %v4238_v7  ;;  %v4253_v14 = vld [vmem:[#allocation6 + $0x30] ss:$12 sps:$4 sm:$0xff]   ;;  %v4256_v15 = vld [vmem:[#allocation6 + $0x4c] ss:$12 sps:$4 sm:$0xff]   ;;  %v4258_v17 = vld [vmem:[#allocation6 + $0x48] ss:$12 sps:$4 sm:$0xff]  }
  0x79   : > { %452 = vmatprep.subr.bf16.mxu0 %v4241_v9  ;;  %v3600_v16 = vld [vmem:[#allocation6 + $0x80] ss:$12 sps:$4 sm:$0xff]   ;;  %v4260_v18 = vld [vmem:[#allocation6 + $0x64] ss:$12 sps:$4 sm:$0xff]   ;;  %v4267_v21 = vld [vmem:[#allocation6 + $0x7c] ss:$12 sps:$4 sm:$0xff]  }
  0x7a   : > { %3319 = vmatpush3.bf16.msra.mxu1 %v3596_v4  ;;  %v3601_v19 = vld [vmem:[#allocation6 + $0x98] ss:$12 sps:$4 sm:$0xff]   ;;  %v4265_v20 = vld [vmem:[#allocation6 + $0x60] ss:$12 sps:$4 sm:$0xff]   ;;  %v3602_v22 = vld [vmem:[#allocation6 + $0xb0] ss:$12 sps:$4 sm:$0xff]  }
  0x7b   : > { %3320 = vmatprep.subr.bf16.mxu1 %v3998_v2  ;;  %v285_v23 = vld [vmem:[#allocation2] sm:$0xff]  ;;  %v4274_v25 = vld [vmem:[#allocation6 + $0x94] ss:$12 sps:$4 sm:$0xff]   ;;  %v4311_v31 = vand.u32 127, %v281_v30  ;;  %v288_v40 = vld [vmem:[%s4213_s7 + $0x8] sm:$0xff]  ;;  %s4001_s24 = smov 64  }
  0x7c   : > { %453 = vmatpush1.bf16.msra.mxu0 %v4246_v11  ;;  %v4272_v24 = vld [vmem:[#allocation6 + $0x78] ss:$12 sps:$4 sm:$0xff]   ;;  %v286_v26 = vpack.c.bf16 %v285_v23, %v285_v23  ;;  %v4279_v27 = vld [vmem:[#allocation6 + $0x90] ss:$12 sps:$4 sm:$0xff]   ;;  %v4286_v29 = vld [vmem:[#allocation6 + $0xa8] ss:$12 sps:$4 sm:$0xff]  }
  0x7d   : > { %454 = vmatprep.subr.bf16.mxu0 %v4249_v12  ;;  %v4281_v28 = vld [vmem:[#allocation6 + $0xac] ss:$12 sps:$4 sm:$0xff]   ;;  %vm283_vm1 = vcmp.eq.s32.totalorder %v4311_v31, 0  ;;  %vm284_vm3 = vcmp.eq.s32.totalorder %v4311_v31, 1  ;;  %v287_v39 = vld [vmem:[%s4213_s7] sm:$0xff] }
  0x7e   : > { %3321 = vmatpush3.bf16.msra.mxu1 %v3597_v5  ;;  %v3627_v56 = vld [vmem:[#allocation6 + $0x8] ss:$12 sps:$4 sm:$0xff]   ;;  %v3628_v57 = vld [vmem:[#allocation6 + $0x20] ss:$12 sps:$4 sm:$0xff]   ;;  %v3629_v58 = vld [vmem:[#allocation6 + $0x38] ss:$12 sps:$4 sm:$0xff]  }
  0x7f   : > { %3322 = vmatprep.subr.bf16.mxu1 %v3998_v2  ;;  %v3630_v59 = vld [vmem:[#allocation6 + $0x50] ss:$12 sps:$4 sm:$0xff]   ;;  %v3631_v60 = vld [vmem:[#allocation6 + $0x68] ss:$12 sps:$4 sm:$0xff]   ;;  %v3632_v61 = vld [vmem:[#allocation6 + $0x80] ss:$12 sps:$4 sm:$0xff]  }
  0x80   : > { %455 = vmatpush1.bf16.msra.mxu0 %v4253_v14  ;;  %v3633_v62 = vld [vmem:[#allocation6 + $0x98] ss:$12 sps:$4 sm:$0xff]   ;;  %v3634_v63 = vld [vmem:[#allocation6 + $0xb0] ss:$12 sps:$4 sm:$0xff]  }
  0x81   : > { %456 = vmatprep.subr.bf16.mxu0 %v4256_v15 }
  0x82   : > { %3323 = vmatpush3.bf16.msra.mxu1 %v3598_v10 }
  0x83   : > { %3324 = vmatprep.subr.bf16.mxu1 %v3998_v2 }
  0x84   : > { %457 = vmatpush1.bf16.msra.mxu0 %v4258_v17 }
  0x85   : > { %458 = vmatprep.subr.bf16.mxu0 %v4260_v18 }
  0x86   : > { %3325 = vmatpush3.bf16.msra.mxu1 %v3599_v13 }
  0x87   : > { %3326 = vmatprep.subr.bf16.mxu1 %v3998_v2 }
  0x88   : > { %459 = vmatpush1.bf16.msra.mxu0 %v4265_v20 }
  0x89   : > { %460 = vmatprep.subr.bf16.mxu0 %v4267_v21 }
  0x8a   : > { %3327 = vmatpush3.bf16.msra.mxu1 %v3600_v16 }
  0x8b   : > { %3328 = vmatprep.subr.bf16.mxu1 %v3998_v2 }
  0x8c   : > { %461 = vmatpush1.bf16.msra.mxu0 %v4272_v24 }
  0x8d   : > { %462 = vmatprep.subr.bf16.mxu0 %v4274_v25 }
  0x8e   : > { %3329 = vmatpush3.bf16.msra.mxu1 %v3601_v19 }
  0x8f   : > { %3330 = vmatprep.subr.bf16.mxu1 %v3998_v2 }
  0x90   : > { %463 = vmatpush1.bf16.msra.mxu0 %v4279_v27 }
  0x91   : > { %464 = vmatprep.subr.bf16.mxu0 %v4281_v28 }
  0x92   : > { %3331 = vmatpush3.bf16.msra.mxu1 %v3602_v22 }
  0x93   : > { %3336 = vmatprep.subr.bf16.mxu1 %v3998_v2 }
  0x94   : > { %465 = vmatpush1.bf16.msra.mxu0 %v4286_v29 }
  0x95   : > { %3333 = vmatmul.mubr.bf16.vlgmr.msra.gmra.mrb[0].mxu1 %v286_v26  ;;  %767 = vmatprep.subr.bf16.mxu0 %v4236_v6 }
  0x96   : > { %3352 = vmatprep.mubr.msk.bf16.mxu1 %vm3999_vm0, %v3998_v2  ;;  %3337 = vmatpush3.bf16.msra.mxu1 %v3627_v56 }
  0x97   : > { %483 = vmatmul.mubr.bf16.vlgmr.msra.gmra.mrb[0].mxu0 %v286_v26  ;;  %3338 = vmatprep.subr.bf16.mxu1 %v3998_v2 }
  0x98   : > { %768 = vmatpush1.bf16.msra.mxu0 %v4238_v7  ;;  %799 = vmatprep.mubr.bf16.mxu0 %v4000_v8 }
  0x99   : > { %769 = vmatprep.subr.bf16.mxu0 %v4241_v9 }
  0x9a   : > { %3339 = vmatpush3.bf16.msra.mxu1 %v3628_v57 }
  0x9b   : > { %3340 = vmatprep.subr.bf16.mxu1 %v3998_v2 }
  0x9c   : > { %770 = vmatpush1.bf16.msra.mxu0 %v4246_v11 }
  0x9d   : > { %771 = vmatprep.subr.bf16.mxu0 %v4249_v12 }
  0x9e   : > { %3341 = vmatpush3.bf16.msra.mxu1 %v3629_v58 }
  0x9f   : > { %3342 = vmatprep.subr.bf16.mxu1 %v3998_v2 }
  0xa0   : > { %772 = vmatpush1.bf16.msra.mxu0 %v4253_v14 }
  0xa1   : > { %773 = vmatprep.subr.bf16.mxu0 %v4256_v15 }
  0xa2   : > { %3343 = vmatpush3.bf16.msra.mxu1 %v3630_v59 }
  0xa3   : > { %3344 = vmatprep.subr.bf16.mxu1 %v3998_v2 }
  0xa4   : > { %774 = vmatpush1.bf16.msra.mxu0 %v4258_v17 }
  0xa5   : > { %775 = vmatprep.subr.bf16.mxu0 %v4260_v18 }
  0xa6   : > { %3345 = vmatpush3.bf16.msra.mxu1 %v3631_v60 }
  0xa7   : > { %3346 = vmatprep.subr.bf16.mxu1 %v3998_v2 }
  0xa8   : > { %776 = vmatpush1.bf16.msra.mxu0 %v4265_v20 }
  0xa9   : > { %777 = vmatprep.subr.bf16.mxu0 %v4267_v21 }
  0xaa   : > { %3347 = vmatpush3.bf16.msra.mxu1 %v3632_v61 }
  0xab   : > { %3348 = vmatprep.subr.bf16.mxu1 %v3998_v2 }
  0xac   : > { %778 = vmatpush1.bf16.msra.mxu0 %v4272_v24 }
  0xad   : > { %779 = vmatprep.subr.bf16.mxu0 %v4274_v25 }
  0xae   : > { %3349 = vmatpush3.bf16.msra.mxu1 %v3633_v62 }
  0xaf   : > { %3350 = vmatprep.subr.bf16.mxu1 %v3998_v2 }
  0xb0   : > { %780 = vmatpush1.bf16.msra.mxu0 %v4279_v27 }
  0xb1   : > { %781 = vmatprep.subr.bf16.mxu0 %v4281_v28 }
  0xb2   : > { %3351 = vmatpush3.bf16.msra.mxu1 %v3634_v63 }
  0xb3   : > { %3356 = vmatprep.subr.bf16.mxu1 %v3998_v2 }
  0xb4   : > { %782 = vmatpush1.bf16.msra.mxu0 %v4286_v29 }
  0xb5   : > { %1085 = vmatprep.subr.bf16.mxu0 %v4236_v6 }
 0x168   : > { %v525_v33 = vpop.f32.mrb[0].mxu1 }
 0x169   : > { %v533_v34 = vadd.f32 %v525_v33, %v289_v32  ;;  %v3334_v35 = vpop.f32.mrb[1].mxu1 }
 0x16a   : > { %v528_v36 = vpop.f32.mrb[2].mxu1  ;;  %v484_v42 = vpop.f32.mrb[0].mxu0 }
 0x16b   : > { %vm551_vm2 = vcmp.gt.f32.partialorder %v533_v34, 0.0  ;;  %v3335_v37 = vpop.f32.mrb[3].mxu1  ;;  %v531_v43 = vadd.f32 %v484_v42, %v287_v39  ;;  %v486_v44 = vpop.f32.mrb[1].mxu0  ;;  %v593_v34 = vld [vmem:[#allocation10] sm:$0xff] }
 0x16c   : > { %vm552_vm4 = vmand %vm551_vm2, %vm283_vm1  ;;  %v532_v45 = vadd.f32 %v486_v44, %v288_v40  ;;  %v488_v46 = vpop.f32.mrb[2].mxu0 }
 0x16d   : > { %v2994_v38 = vsel %vm552_vm4, 1.0, %v3998_v2  ;;  %vm564_vm5 = vmand %vm551_vm2, %vm284_vm3  ;;  %v2992_v47 = vmul.f32 -1.442695, %v531_v43  ;;  %v489_v48 = vpop.f32.mrb[3].mxu0 }
 0x16e   : > { %555 = vadd.xlane.f32.xlu0 %v2994_v38  ;;  %v2995_v41 = vsel %vm564_vm5, 1.0, %v3998_v2  ;;  %v2993_v49 = vmul.f32 -1.442695, %v532_v45  ;;  %v3000_v48 = vld [vmem:[%s4213_s7 + $0x28] sm:$0xff] }
 0x16f   : > { %3707 = vpow2.f32 %v2992_v47  ;;  %v2998_v47 = vld [vmem:[%s4213_s7 + $0x18] sm:$0xff] }
 0x170   : > { %3709 = vpow2.f32 %v2993_v49  ;;  %v2999_v49 = vld [vmem:[%s4213_s7 + $0x20] sm:$0xff] }
 0x172   : > { %567 = vadd.xlane.f32.xlu0 %v2995_v41 }
 0x179   : > { %v3708_v50 = vpop.eup %3707 }
 0x17a   : > { %v3710_v51 = vpop.eup %3709  ;;  %v537_v52 = vadd.f32 1.0, %v3708_v50 }
 0x17b   : > { %v544_v53 = vadd.f32 1.0, %v3710_v51 }
 0x17c   : > { %3711 = vrcp.f32 %v537_v52 }
 0x17d   : > { %3713 = vrcp.f32 %v544_v53 }
 0x17e   : > { %3715 = vtanh.f32 %v532_v45 }
 0x186   : > { %v4324_v54 = vpop.eup %3711 }
 0x187   : > { %547 = vrot.lane.b32.xlu1 %v4324_v54, %s4001_s24  ;;  %v3714_v55 = vpop.eup %3713 }
 0x188   : > { %v3716_v33 = vpop.eup %3715 }
 0x189   : > { %v584_v37 = vmul.f32 %v3716_v33, %v4324_v54 }
 0x18b   : > { %549 = vrot.lane.b32.xlu1 %v3714_v55, %s4001_s24 }
 0x1f9   : > { %v548_v35 = vpop.permute.xlu1 %547 }
 0x1fa   : > { %v594_v38 = vmul.f32 %v593_v34, %v548_v35 }
 0x1fb   : > { %v556_v0 = vpop.xlane.xlu0 %555 }
 0x1fc   : > { %v557_v1 = vrot.slane %v556_v0, 4 }
 0x1fd   : > { %v550_v44 = vpop.permute.xlu1 %549 }
 0x1fe   : > { %v558_v3 = vadd.f32 %v557_v1, %v556_v0 }
 0x1ff   : > { %v568_v4 = vpop.xlane.xlu0 %567 }
 0x200   : > { %v559_v5 = vrot.slane %v558_v3, 2  ;;  %v569_v10 = vrot.slane %v568_v4, 4 }
 0x202   : > { %v570_v13 = vadd.f32 %v569_v10, %v568_v4  ;;  %v560_v16 = vadd.f32 %v559_v5, %v558_v3 }
 0x204   : > { %v571_v19 = vrot.slane %v570_v13, 2  ;;  %v561_v22 = vrot.slane %v560_v16, 1 }
 0x206   : > { %v562_v23 = vadd.f32 %v561_v22, %v560_v16  ;;  %v572_v26 = vadd.f32 %v571_v19, %v570_v13  ;;  %v3635_v13 = vld [vmem:[#allocation6 + $0x8] ss:$12 sps:$4 sm:$0xff]   ;;  %v3636_v16 = vld [vmem:[#allocation6 + $0x20] ss:$12 sps:$4 sm:$0xff]   ;;  %v3637_v19 = vld [vmem:[#allocation6 + $0x38] ss:$12 sps:$4 sm:$0xff]  }
 0x207   : > { %v3638_v22 = vld [vmem:[#allocation6 + $0x50] ss:$12 sps:$4 sm:$0xff]  }
 0x208   : > { %3479 = vpush %v562_v23  ;;  %v573_v30 = vrot.slane %v572_v26, 1  ;;  %v3639_v23 = vld [vmem:[#allocation6 + $0x68] ss:$12 sps:$4 sm:$0xff]  }
 0x20a   : > { %v574_v32 = vadd.f32 %v573_v30, %v572_v26  ;;  %v3640_v26 = vld [vmem:[#allocation6 + $0x80] ss:$12 sps:$4 sm:$0xff]   ;;  %v3641_v30 = vld [vmem:[#allocation6 + $0x98] ss:$12 sps:$4 sm:$0xff]  }
 0x20c   : > { %3481 = vpush %v574_v32  ;;  %v3642_v32 = vld [vmem:[#allocation6 + $0xb0] ss:$12 sps:$4 sm:$0xff]  }
 0x239   : > { %s3480_s28 = spop %3479 }
 0x23a   : > { %p577_p3 = scmp.gt.f32.partialorder %s3480_s28, 4.0  ;;  %p581_p1 = scmp.lt.f32.partialorder %s3480_s28, 4.0 }
 0x23d   : > { %s3482_s23 = spop %3481 }
 0x23e   : > { %p576_p11 = scmp.lt.f32.partialorder %s3482_s23, 4.0  ;;  %p580_p7 = scmp.gt.f32.partialorder %s3482_s23, 4.0 }
 0x240   : > { %p578_p10 = pnand %p577_p3, %p576_p11  ;;  %p582_p13 = pnand %p581_p1, %p580_p7 }
 0x242   : > { %s2996_s27 = scalar_select %p582_p13, 0, 1 }
 0x243   : > { %s2997_s8 = scalar_select %p578_p10, 0, 1 }
 0x244   : > { %v586_v36 = vstv %s2996_s27 }
 0x245   : > { %vm587_vm6 = vcmp.eq.s32.totalorder %v586_v36, 1  ;;  %v590_v39 = vstv %s2997_s8 }
 0x246   : > { %vm591_vm7 = vcmp.eq.s32.totalorder %v590_v39, 1  ;;  %v588_v40 = vsel %vm587_vm6, %v3716_v33, %v584_v37 }
 0x247   : > { %v592_v41 = vsel %vm591_vm7, %v4324_v54, %v588_v40 }
 0x248   : > { %v4339_v42 = vadd.f32 %v594_v38, %v592_v41 }
 0x24a   : > { %3717 = vtanh.f32 %v4339_v42 }
 0x254   : > { %v3718_v43 = vpop.eup %3717 }
 0x255   : > { %v597_v45 = vmul.f32 %v3718_v43, %v550_v44 }
 0x257   : > { %600 = vst [vmem:[%s4224_s30] sm:$0xff] %v597_v45  ;;  %v602_v46 = vpack.c.bf16 %v597_v45, %v597_v45 }
 0x259   : > { %800 = vmatmul.mubr.bf16.vlgmr.msra.gmra.mrb[4].mxu0 %v602_v46  ;;  %3353 = vmatmul.mubr.bf16.vlgmr.msra.gmra.mrb[4].mxu1 %v602_v46 }
 0x25a   : > { %1086 = vmatpush1.bf16.msra.mxu0 %v4238_v7  ;;  %1117 = vmatprep.mubr.bf16.mxu0 %v4000_v8 }
 0x25b   : > { %1087 = vmatprep.subr.bf16.mxu0 %v4241_v9  ;;  %3372 = vmatprep.mubr.msk.bf16.mxu1 %vm3999_vm0, %v3998_v2 }
 0x25c   : > { %3357 = vmatpush3.bf16.msra.mxu1 %v3635_v13  ;;  %v3645_v13 = vld [vmem:[#allocation6 + $0x38] ss:$12 sps:$4 sm:$0xff]  }
 0x25d   : > { %3358 = vmatprep.subr.bf16.mxu1 %v3998_v2 }
 0x25e   : > { %1088 = vmatpush1.bf16.msra.mxu0 %v4246_v11 }
 0x25f   : > { %1089 = vmatprep.subr.bf16.mxu0 %v4249_v12 }
 0x260   : > { %3359 = vmatpush3.bf16.msra.mxu1 %v3636_v16  ;;  %v3646_v16 = vld [vmem:[#allocation6 + $0x50] ss:$12 sps:$4 sm:$0xff]  }
 0x261   : > { %3360 = vmatprep.subr.bf16.mxu1 %v3998_v2 }
 0x262   : > { %1090 = vmatpush1.bf16.msra.mxu0 %v4253_v14 }
 0x263   : > { %1091 = vmatprep.subr.bf16.mxu0 %v4256_v15 }
 0x264   : > { %3361 = vmatpush3.bf16.msra.mxu1 %v3637_v19  ;;  %v3647_v19 = vld [vmem:[#allocation6 + $0x68] ss:$12 sps:$4 sm:$0xff]  }
 0x265   : > { %3362 = vmatprep.subr.bf16.mxu1 %v3998_v2 }
 0x266   : > { %1092 = vmatpush1.bf16.msra.mxu0 %v4258_v17 }
 0x267   : > { %1093 = vmatprep.subr.bf16.mxu0 %v4260_v18 }
 0x268   : > { %3363 = vmatpush3.bf16.msra.mxu1 %v3638_v22  ;;  %v3648_v22 = vld [vmem:[#allocation6 + $0x80] ss:$12 sps:$4 sm:$0xff]  }
 0x269   : > { %3364 = vmatprep.subr.bf16.mxu1 %v3998_v2 }
 0x26a   : > { %1094 = vmatpush1.bf16.msra.mxu0 %v4265_v20 }
 0x26b   : > { %1095 = vmatprep.subr.bf16.mxu0 %v4267_v21 }
 0x26c   : > { %3365 = vmatpush3.bf16.msra.mxu1 %v3639_v23  ;;  %v3649_v23 = vld [vmem:[#allocation6 + $0x98] ss:$12 sps:$4 sm:$0xff]  }
 0x26d   : > { %3366 = vmatprep.subr.bf16.mxu1 %v3998_v2 }
 0x26e   : > { %1096 = vmatpush1.bf16.msra.mxu0 %v4272_v24 }
 0x26f   : > { %1097 = vmatprep.subr.bf16.mxu0 %v4274_v25 }
 0x270   : > { %3367 = vmatpush3.bf16.msra.mxu1 %v3640_v26  ;;  %v3650_v26 = vld [vmem:[#allocation6 + $0xb0] ss:$12 sps:$4 sm:$0xff]  }
 0x271   : > { %3368 = vmatprep.subr.bf16.mxu1 %v3998_v2 }
 0x272   : > { %1098 = vmatpush1.bf16.msra.mxu0 %v4279_v27 }
 0x273   : > { %1099 = vmatprep.subr.bf16.mxu0 %v4281_v28 }
 0x274   : > { %3369 = vmatpush3.bf16.msra.mxu1 %v3641_v30 }
 0x275   : > { %3370 = vmatprep.subr.bf16.mxu1 %v3998_v2 }
 0x276   : > { %1100 = vmatpush1.bf16.msra.mxu0 %v4286_v29 }
 0x277   : > { %1403 = vmatprep.subr.bf16.mxu0 %v4236_v6 }
 0x278   : > { %3371 = vmatpush3.bf16.msra.mxu1 %v3642_v32 }
 0x279   : > { %3376 = vmatprep.subr.bf16.mxu1 %v3998_v2 }
 0x32c   : > { %v801_v50 = vpop.f32.mrb[4].mxu0  ;;  %v842_v51 = vpop.f32.mrb[4].mxu1 }
 0x32d   : > { %v848_v52 = vadd.f32 %v2998_v47, %v801_v50  ;;  %v850_v53 = vadd.f32 %v3000_v48, %v842_v51  ;;  %v803_v54 = vpop.f32.mrb[5].mxu0  ;;  %v3354_v55 = vpop.f32.mrb[5].mxu1 }
 0x32e   : > { %v4365_v56 = vadd.f32 %v2999_v49, %v803_v54  ;;  %v805_v57 = vpop.f32.mrb[6].mxu0  ;;  %v845_v58 = vpop.f32.mrb[6].mxu1 }
 0x32f   : > { %v3025_v59 = vmul.f32 -1.442695, %v848_v52  ;;  %vm868_vm8 = vcmp.gt.f32.partialorder %v850_v53, 0.0  ;;  %v806_v60 = vpop.f32.mrb[7].mxu0  ;;  %v3355_v61 = vpop.f32.mrb[7].mxu1 }
 0x330   : > { %v3026_v62 = vmul.f32 -1.442695, %v4365_v56  ;;  %vm881_vm9 = vmand %vm868_vm8, %vm284_vm3 }
 0x331   : > { %3719 = vpow2.f32 %v3025_v59  ;;  %v3028_v6 = vsel %vm881_vm9, 1.0, %v3998_v2  ;;  %vm869_vm10 = vmand %vm868_vm8, %vm283_vm1 }
 0x332   : > { %3721 = vpow2.f32 %v3026_v62  ;;  %884 = vadd.xlane.f32.xlu1 %v3028_v6  ;;  %v3027_v63 = vsel %vm869_vm10, 1.0, %v3998_v2 }
 0x333   : > { %872 = vadd.xlane.f32.xlu0 %v3027_v63 }
 0x33b   : > { %v3720_v0 = vpop.eup %3719 }
 0x33c   : > { %v3722_v1 = vpop.eup %3721  ;;  %v854_v3 = vadd.f32 1.0, %v3720_v0 }
 0x33d   : > { %v861_v4 = vadd.f32 1.0, %v3722_v1 }
 0x33e   : > { %3723 = vrcp.f32 %v854_v3 }
 0x33f   : > { %3725 = vrcp.f32 %v861_v4 }
 0x340   : > { %3727 = vtanh.f32 %v4365_v56 }
 0x348   : > { %v4374_v5 = vpop.eup %3723 }
 0x349   : > { %864 = vrot.lane.b32.xlu0 %v4374_v5, %s4001_s24  ;;  %v3726_v10 = vpop.eup %3725 }
 0x34a   : > { %v3728_v48 = vpop.eup %3727 }
 0x34b   : > { %v901_v50 = vmul.f32 %v3728_v48, %v4374_v5 }
 0x34d   : > { %866 = vrot.lane.b32.xlu0 %v3726_v10, %s4001_s24  ;;  %v3644_v10 = vld [vmem:[#allocation6 + $0x20] ss:$12 sps:$4 sm:$0xff]  }
 0x3bf   : > { %v885_v33 = vpop.xlane.xlu1 %884 }
 0x3c0   : > { %v886_v34 = vrot.slane %v885_v33, 4  ;;  %v873_v35 = vpop.xlane.xlu0 %872 }
 0x3c1   : > { %v874_v36 = vrot.slane %v873_v35, 4 }
 0x3c2   : > { %v887_v37 = vadd.f32 %v886_v34, %v885_v33 }
 0x3c3   : > { %v875_v38 = vadd.f32 %v874_v36, %v873_v35 }
 0x3c4   : > { %v888_v39 = vrot.slane %v887_v37, 2  ;;  %v865_v49 = vpop.permute.xlu0 %864 }
 0x3c5   : > { %v876_v40 = vrot.slane %v875_v38, 2  ;;  %v911_v53 = vmul.f32 %v865_v49, %v4339_v42 }
 0x3c6   : > { %v889_v41 = vadd.f32 %v888_v39, %v887_v37 }
 0x3c7   : > { %v877_v43 = vadd.f32 %v876_v40, %v875_v38 }
 0x3c8   : > { %v890_v44 = vrot.slane %v889_v41, 1  ;;  %v867_v58 = vpop.permute.xlu0 %866 }
 0x3c9   : > { %v878_v45 = vrot.slane %v877_v43, 1 }
 0x3ca   : > { %v891_v46 = vadd.f32 %v890_v44, %v889_v41 }
 0x3cb   : > { %v879_v47 = vadd.f32 %v878_v45, %v877_v43 }
 0x3cd   : > { %3483 = vpush %v879_v47 }
 0x3ce   : > { %3485 = vpush %v891_v46 }
 0x3fe   : > { %s3484_s10 = spop %3483 }
 0x3ff   : > { %p894_p2 = scmp.gt.f32.partialorder %s3484_s10, 4.0  ;;  %p898_p0 = scmp.lt.f32.partialorder %s3484_s10, 4.0 }
 0x400   : > { %s3486_s12 = spop %3485 }
 0x401   : > { %p893_p6 = scmp.lt.f32.partialorder %s3486_s12, 4.0  ;;  %p897_p8 = scmp.gt.f32.partialorder %s3486_s12, 4.0 }
 0x403   : > { %p895_p4 = pnand %p894_p2, %p893_p6  ;;  %p899_p5 = pnand %p898_p0, %p897_p8 }
 0x405   : > { %s3029_s13 = scalar_select %p899_p5, 0, 1 }
 0x406   : > { %s3030_s15 = scalar_select %p895_p4, 0, 1 }
 0x407   : > { %v903_v51 = vstv %s3029_s13 }
 0x408   : > { %vm904_vm11 = vcmp.eq.s32.totalorder %v903_v51, 1  ;;  %v907_v52 = vstv %s3030_s15 }
 0x409   : > { %v905_v54 = vsel %vm904_vm11, %v3728_v48, %v901_v50  ;;  %vm908_vm12 = vcmp.eq.s32.totalorder %v907_v52, 1 }
 0x40a   : > { %v909_v55 = vsel %vm908_vm12, %v4374_v5, %v905_v54  ;;  %v3643_v5 = vld [vmem:[#allocation6 + $0x8] ss:$12 sps:$4 sm:$0xff]  }
 0x40b   : > { %v4391_v56 = vadd.f32 %v911_v53, %v909_v55 }
 0x40d   : > { %3729 = vtanh.f32 %v4391_v56 }
 0x417   : > { %v3730_v57 = vpop.eup %3729 }
 0x418   : > { %v914_v59 = vmul.f32 %v3730_v57, %v867_v58 }
 0x41a   : > { %3031 = vst [vmem:[%s4224_s30 + $0x8] sm:$0xff] %v914_v59  ;;  %v920_v60 = vpack.c.bf16 %v914_v59, %v914_v59 }
 0x41c   : > { %1118 = vmatmul.mubr.bf16.vlgmr.msra.gmra.mrb[8].mxu0 %v920_v60  ;;  %3373 = vmatmul.mubr.bf16.vlgmr.msra.gmra.mrb[8].mxu1 %v920_v60  ;;  %v3068_v60 = vld [vmem:[%s4213_s7 + $0x58] sm:$0xff] }
 0x41d   : > { %1404 = vmatpush1.bf16.msra.mxu0 %v4238_v7  ;;  %1435 = vmatprep.mubr.bf16.mxu0 %v4000_v8  ;;  %v3032_v7 = vld [vmem:[%s4213_s7 + $0x30] sm:$0xff] }
 0x41e   : > { %1405 = vmatprep.subr.bf16.mxu0 %v4241_v9  ;;  %3392 = vmatprep.mubr.msk.bf16.mxu1 %vm3999_vm0, %v3998_v2  ;;  %v3034_v9 = vld [vmem:[%s4213_s7 + $0x40] sm:$0xff] }
 0x41f   : > { %3377 = vmatpush3.bf16.msra.mxu1 %v3643_v5  ;;  %v3654_v5 = vld [vmem:[#allocation6 + $0x8] ss:$12 sps:$4 sm:$0xff]  }
 0x420   : > { %3378 = vmatprep.subr.bf16.mxu1 %v3998_v2 }
 0x421   : > { %1406 = vmatpush1.bf16.msra.mxu0 %v4246_v11  ;;  %v3033_v11 = vld [vmem:[%s4213_s7 + $0x38] sm:$0xff] }
 0x422   : > { %1407 = vmatprep.subr.bf16.mxu0 %v4249_v12 }
 0x423   : > { %3379 = vmatpush3.bf16.msra.mxu1 %v3644_v10  ;;  %v4472_v10 = vld [vmem:[#allocation6 + $0x1c] ss:$12 sps:$4 sm:$0xff]  }
 0x424   : > { %3380 = vmatprep.subr.bf16.mxu1 %v3998_v2 }
 0x425   : > { %1408 = vmatpush1.bf16.msra.mxu0 %v4253_v14 }
 0x426   : > { %1409 = vmatprep.subr.bf16.mxu0 %v4256_v15 }
 0x427   : > { %3381 = vmatpush3.bf16.msra.mxu1 %v3645_v13  ;;  %v4475_v13 = vld [vmem:[#allocation6 + $0x18] ss:$12 sps:$4 sm:$0xff]  }
 0x428   : > { %3382 = vmatprep.subr.bf16.mxu1 %v3998_v2 }
 0x429   : > { %1410 = vmatpush1.bf16.msra.mxu0 %v4258_v17 }
 0x42a   : > { %1411 = vmatprep.subr.bf16.mxu0 %v4260_v18 }
 0x42b   : > { %3383 = vmatpush3.bf16.msra.mxu1 %v3646_v16  ;;  %v3658_v16 = vld [vmem:[#allocation6 + $0x20] ss:$12 sps:$4 sm:$0xff]  }
 0x42c   : > { %3384 = vmatprep.subr.bf16.mxu1 %v3998_v2 }
 0x42d   : > { %1412 = vmatpush1.bf16.msra.mxu0 %v4265_v20 }
 0x42e   : > { %1413 = vmatprep.subr.bf16.mxu0 %v4267_v21 }
 0x42f   : > { %3385 = vmatpush3.bf16.msra.mxu1 %v3647_v19  ;;  %v4479_v19 = vld [vmem:[#allocation6 + $0x34] ss:$12 sps:$4 sm:$0xff]  }
 0x430   : > { %3386 = vmatprep.subr.bf16.mxu1 %v3998_v2 }
 0x431   : > { %1414 = vmatpush1.bf16.msra.mxu0 %v4272_v24 }
 0x432   : > { %1415 = vmatprep.subr.bf16.mxu0 %v4274_v25 }
 0x433   : > { %3387 = vmatpush3.bf16.msra.mxu1 %v3648_v22  ;;  %v4482_v22 = vld [vmem:[#allocation6 + $0x30] ss:$12 sps:$4 sm:$0xff]  }
 0x434   : > { %3388 = vmatprep.subr.bf16.mxu1 %v3998_v2 }
 0x435   : > { %1416 = vmatpush1.bf16.msra.mxu0 %v4279_v27 }
 0x436   : > { %1417 = vmatprep.subr.bf16.mxu0 %v4281_v28 }
 0x437   : > { %3389 = vmatpush3.bf16.msra.mxu1 %v3649_v23  ;;  %v3662_v23 = vld [vmem:[#allocation6 + $0x38] ss:$12 sps:$4 sm:$0xff]  }
 0x438   : > { %3390 = vmatprep.subr.bf16.mxu1 %v3998_v2 }
 0x439   : > { %1418 = vmatpush1.bf16.msra.mxu0 %v4286_v29 }
 0x43b   : > { %3391 = vmatpush3.bf16.msra.mxu1 %v3650_v26  ;;  %v4486_v26 = vld [vmem:[#allocation6 + $0x4c] ss:$12 sps:$4 sm:$0xff]  }
 0x43c   : > { %3396 = vmatprep.subr.bf16.mxu1 %v3998_v2 }
 0x4ef   : > { %v1119_v12 = vpop.f32.mrb[8].mxu0  ;;  %v1160_v14 = vpop.f32.mrb[8].mxu1 }
 0x4f0   : > { %v1166_v15 = vadd.f32 %v3032_v7, %v1119_v12  ;;  %v1168_v17 = vadd.f32 %v3034_v9, %v1160_v14  ;;  %v1121_v18 = vpop.f32.mrb[9].mxu0  ;;  %v3374_v20 = vpop.f32.mrb[9].mxu1  ;;  %v3067_v7 = vld [vmem:[%s4213_s7 + $0x50] sm:$0xff] }
 0x4f1   : > { %v4416_v21 = vadd.f32 %v3033_v11, %v1121_v18  ;;  %v1123_v24 = vpop.f32.mrb[10].mxu0  ;;  %v1163_v42 = vpop.f32.mrb[10].mxu1 }
 0x4f2   : > { %v3059_v25 = vmul.f32 -1.442695, %v1166_v15  ;;  %vm1186_vm13 = vcmp.gt.f32.partialorder %v1168_v17, 0.0  ;;  %v1124_v27 = vpop.f32.mrb[11].mxu0  ;;  %v3375_v61 = vpop.f32.mrb[11].mxu1 }
 0x4f3   : > { %v3060_v28 = vmul.f32 -1.442695, %v4416_v21  ;;  %vm1199_vm14 = vmand %vm1186_vm13, %vm284_vm3 }
 0x4f4   : > { %3731 = vpow2.f32 %v3059_v25  ;;  %v3062_v29 = vsel %vm1199_vm14, 1.0, %v3998_v2  ;;  %vm1187_vm15 = vmand %vm1186_vm13, %vm283_vm1 }
 0x4f5   : > { %3733 = vpow2.f32 %v3060_v28  ;;  %1202 = vadd.xlane.f32.xlu1 %v3062_v29  ;;  %v3061_v62 = vsel %vm1187_vm15, 1.0, %v3998_v2 }
 0x4f6   : > { %1190 = vadd.xlane.f32.xlu0 %v3061_v62 }
 0x4fe   : > { %v3732_v6 = vpop.eup %3731 }
 0x4ff   : > { %v3734_v63 = vpop.eup %3733  ;;  %v1172_v0 = vadd.f32 1.0, %v3732_v6 }
 0x500   : > { %v1179_v1 = vadd.f32 1.0, %v3734_v63 }
 0x501   : > { %3735 = vrcp.f32 %v1172_v0 }
 0x502   : > { %3737 = vrcp.f32 %v1179_v1 }
 0x503   : > { %3739 = vtanh.f32 %v4416_v21 }
 0x50b   : > { %v4425_v3 = vpop.eup %3735 }
 0x50c   : > { %1182 = vrot.lane.b32.xlu1 %v4425_v3, %s4001_s24  ;;  %v3738_v4 = vpop.eup %3737 }
 0x50d   : > { %v3740_v46 = vpop.eup %3739 }
 0x50e   : > { %v1219_v48 = vmul.f32 %v3740_v46, %v4425_v3 }
 0x510   : > { %1184 = vrot.lane.b32.xlu1 %v3738_v4, %s4001_s24  ;;  %v4468_v4 = vld [vmem:[#allocation6] ss:$12 sps:$4 sm:$0xff]  }
 0x582   : > { %v1203_v30 = vpop.xlane.xlu1 %1202 }
 0x583   : > { %v1204_v32 = vrot.slane %v1203_v30, 4  ;;  %v1191_v33 = vpop.xlane.xlu0 %1190 }
 0x584   : > { %v1192_v34 = vrot.slane %v1191_v33, 4 }
 0x585   : > { %v1205_v35 = vadd.f32 %v1204_v32, %v1203_v30  ;;  %v4489_v30 = vld [vmem:[#allocation6 + $0x48] ss:$12 sps:$4 sm:$0xff]   ;;  %v3666_v32 = vld [vmem:[#allocation6 + $0x50] ss:$12 sps:$4 sm:$0xff]  }
 0x586   : > { %v1193_v36 = vadd.f32 %v1192_v34, %v1191_v33  ;;  %v1183_v47 = vpop.permute.xlu1 %1182  ;;  %v4493_v33 = vld [vmem:[#allocation6 + $0x64] ss:$12 sps:$4 sm:$0xff]   ;;  %v4496_v34 = vld [vmem:[#allocation6 + $0x60] ss:$12 sps:$4 sm:$0xff]  }
 0x587   : > { %v1206_v37 = vrot.slane %v1205_v35, 2  ;;  %v1229_v51 = vmul.f32 %v1183_v47, %v4391_v56  ;;  %v3066_v56 = vld [vmem:[%s4213_s7 + $0x48] sm:$0xff] }
 0x588   : > { %v1194_v38 = vrot.slane %v1193_v36, 2 }
 0x589   : > { %v1207_v39 = vadd.f32 %v1206_v37, %v1205_v35  ;;  %v3670_v35 = vld [vmem:[#allocation6 + $0x68] ss:$12 sps:$4 sm:$0xff]   ;;  %v4503_v37 = vld [vmem:[#allocation6 + $0x78] ss:$12 sps:$4 sm:$0xff]  }
 0x58a   : > { %v1195_v40 = vadd.f32 %v1194_v38, %v1193_v36  ;;  %v1185_v57 = vpop.permute.xlu1 %1184  ;;  %v4500_v36 = vld [vmem:[#allocation6 + $0x7c] ss:$12 sps:$4 sm:$0xff]   ;;  %v3674_v38 = vld [vmem:[#allocation6 + $0x80] ss:$12 sps:$4 sm:$0xff]  }
 0x58b   : > { %v1208_v41 = vrot.slane %v1207_v39, 1 }
 0x58c   : > { %v1196_v43 = vrot.slane %v1195_v40, 1 }
 0x58d   : > { %v1209_v44 = vadd.f32 %v1208_v41, %v1207_v39  ;;  %v4507_v39 = vld [vmem:[#allocation6 + $0x94] ss:$12 sps:$4 sm:$0xff]   ;;  %v3678_v41 = vld [vmem:[#allocation6 + $0x98] ss:$12 sps:$4 sm:$0xff]  }
 0x58e   : > { %v1197_v45 = vadd.f32 %v1196_v43, %v1195_v40  ;;  %v4510_v40 = vld [vmem:[#allocation6 + $0x90] ss:$12 sps:$4 sm:$0xff]   ;;  %v4514_v43 = vld [vmem:[#allocation6 + $0xac] ss:$12 sps:$4 sm:$0xff]  }
 0x590   : > { %3487 = vpush %v1197_v45  ;;  %v3682_v45 = vld [vmem:[#allocation6 + $0xb0] ss:$12 sps:$4 sm:$0xff]  }
 0x591   : > { %3489 = vpush %v1209_v44  ;;  %v4517_v44 = vld [vmem:[#allocation6 + $0xa8] ss:$12 sps:$4 sm:$0xff]  }
 0x5c1   : > { %s3488_s6 = spop %3487 }
 0x5c2   : > { %p1212_p9 = scmp.gt.f32.partialorder %s3488_s6, 4.0  ;;  %p1216_p12 = scmp.lt.f32.partialorder %s3488_s6, 4.0 }
 0x5c3   : > { %s3490_s26 = spop %3489 }
 0x5c4   : > { %p1211_p3 = scmp.lt.f32.partialorder %s3490_s26, 4.0  ;;  %p1215_p1 = scmp.gt.f32.partialorder %s3490_s26, 4.0 }
 0x5c6   : > { %p1213_p11 = pnand %p1212_p9, %p1211_p3  ;;  %p1217_p7 = pnand %p1216_p12, %p1215_p1 }
 0x5c8   : > { %s3063_s9 = scalar_select %p1217_p7, 0, 1 }
 0x5c9   : > { %s3064_s11 = scalar_select %p1213_p11, 0, 1 }
 0x5ca   : > { %v1221_v49 = vstv %s3063_s9 }
 0x5cb   : > { %vm1222_vm2 = vcmp.eq.s32.totalorder %v1221_v49, 1  ;;  %v1225_v50 = vstv %s3064_s11 }
 0x5cc   : > { %v1223_v52 = vsel %vm1222_vm2, %v3740_v46, %v1219_v48  ;;  %vm1226_vm4 = vcmp.eq.s32.totalorder %v1225_v50, 1 }
 0x5cd   : > { %v1227_v53 = vsel %vm1226_vm4, %v4425_v3, %v1223_v52  ;;  %v4466_v3 = vld [vmem:[#allocation6 + $0x4] ss:$12 sps:$4 sm:$0xff]  }
 0x5ce   : > { %v4442_v54 = vadd.f32 %v1229_v51, %v1227_v53  ;;  %1721 = vmatprep.subr.bf16.mxu0 %v4466_v3 }
 0x5d0   : > { %3741 = vtanh.f32 %v4442_v54 }
 0x5da   : > { %v3742_v55 = vpop.eup %3741 }
 0x5db   : > { %v1232_v58 = vmul.f32 %v3742_v55, %v1185_v57 }
 0x5dd   : > { %3065 = vst [vmem:[%s4224_s30 + $0x10] sm:$0xff] %v1232_v58  ;;  %v1238_v59 = vpack.c.bf16 %v1232_v58, %v1232_v58 }
 0x5df   : > { %1436 = vmatmul.mubr.bf16.vlgmr.msra.gmra.mrb[12].mxu0 %v1238_v59  ;;  %3393 = vmatmul.mubr.bf16.vlgmr.msra.gmra.mrb[12].mxu1 %v1238_v59 }
 0x5e0   : > { %1753 = vmatprep.mubr.bf16.mxu0 %v4000_v8  ;;  %3412 = vmatprep.mubr.msk.bf16.mxu1 %vm3999_vm0, %v3998_v2 }
 0x5e1   : > { %1722 = vmatpush1.bf16.msra.mxu0 %v4468_v4  ;;  %3397 = vmatpush3.bf16.msra.mxu1 %v3654_v5 }
 0x5e2   : > { %3398 = vmatprep.subr.bf16.mxu1 %v3998_v2  ;;  %1723 = vmatprep.subr.bf16.mxu0 %v4472_v10 }
 0x5e5   : > { %1724 = vmatpush1.bf16.msra.mxu0 %v4475_v13  ;;  %3399 = vmatpush3.bf16.msra.mxu1 %v3658_v16 }
 0x5e6   : > { %3400 = vmatprep.subr.bf16.mxu1 %v3998_v2  ;;  %1725 = vmatprep.subr.bf16.mxu0 %v4479_v19 }
 0x5e9   : > { %1726 = vmatpush1.bf16.msra.mxu0 %v4482_v22  ;;  %3401 = vmatpush3.bf16.msra.mxu1 %v3662_v23 }
 0x5ea   : > { %3402 = vmatprep.subr.bf16.mxu1 %v3998_v2  ;;  %1727 = vmatprep.subr.bf16.mxu0 %v4486_v26 }
 0x5ed   : > { %1728 = vmatpush1.bf16.msra.mxu0 %v4489_v30  ;;  %3403 = vmatpush3.bf16.msra.mxu1 %v3666_v32 }
 0x5ee   : > { %3404 = vmatprep.subr.bf16.mxu1 %v3998_v2  ;;  %1729 = vmatprep.subr.bf16.mxu0 %v4493_v33 }
 0x5f1   : > { %1730 = vmatpush1.bf16.msra.mxu0 %v4496_v34  ;;  %3405 = vmatpush3.bf16.msra.mxu1 %v3670_v35 }
 0x5f2   : > { %3406 = vmatprep.subr.bf16.mxu1 %v3998_v2  ;;  %1731 = vmatprep.subr.bf16.mxu0 %v4500_v36 }
 0x5f5   : > { %1732 = vmatpush1.bf16.msra.mxu0 %v4503_v37  ;;  %3407 = vmatpush3.bf16.msra.mxu1 %v3674_v38 }
 0x5f6   : > { %3408 = vmatprep.subr.bf16.mxu1 %v3998_v2  ;;  %1733 = vmatprep.subr.bf16.mxu0 %v4507_v39 }
 0x5f9   : > { %1734 = vmatpush1.bf16.msra.mxu0 %v4510_v40  ;;  %3409 = vmatpush3.bf16.msra.mxu1 %v3678_v41 }
 0x5fa   : > { %3410 = vmatprep.subr.bf16.mxu1 %v3998_v2  ;;  %1735 = vmatprep.subr.bf16.mxu0 %v4514_v43 }
 0x5fd   : > { %1736 = vmatpush1.bf16.msra.mxu0 %v4517_v44  ;;  %3411 = vmatpush3.bf16.msra.mxu1 %v3682_v45 }
 0x5fe   : > { %2039 = vmatprep.subr.bf16.mxu0 %v4466_v3  ;;  %3416 = vmatprep.subr.bf16.mxu1 %v3998_v2 }
 0x6b2   : > { %v1437_v9 = vpop.f32.mrb[12].mxu0  ;;  %v1478_v11 = vpop.f32.mrb[12].mxu1 }
 0x6b3   : > { %v1484_v12 = vadd.f32 %v3066_v56, %v1437_v9  ;;  %v1486_v14 = vadd.f32 %v3068_v60, %v1478_v11  ;;  %v1439_v15 = vpop.f32.mrb[13].mxu0  ;;  %v3394_v17 = vpop.f32.mrb[13].mxu1 }
 0x6b4   : > { %v4452_v18 = vadd.f32 %v3067_v7, %v1439_v15  ;;  %v1441_v20 = vpop.f32.mrb[14].mxu0  ;;  %v1481_v21 = vpop.f32.mrb[14].mxu1 }
 0x6b5   : > { %v3093_v24 = vmul.f32 -1.442695, %v1484_v12  ;;  %vm1504_vm5 = vcmp.gt.f32.partialorder %v1486_v14, 0.0  ;;  %v1442_v42 = vpop.f32.mrb[15].mxu0  ;;  %v3395_v25 = vpop.f32.mrb[15].mxu1 }
 0x6b6   : > { %v3094_v27 = vmul.f32 -1.442695, %v4452_v18  ;;  %vm1517_vm6 = vmand %vm1504_vm5, %vm284_vm3 }
 0x6b7   : > { %3743 = vpow2.f32 %v3093_v24  ;;  %v3096_v61 = vsel %vm1517_vm6, 1.0, %v3998_v2  ;;  %vm1505_vm7 = vmand %vm1504_vm5, %vm283_vm1 }
 0x6b8   : > { %3745 = vpow2.f32 %v3094_v27  ;;  %1520 = vadd.xlane.f32.xlu1 %v3096_v61  ;;  %v3095_v28 = vsel %vm1505_vm7, 1.0, %v3998_v2  ;;  %v3102_v27 = vld [vmem:[%s4213_s7 + $0x70] sm:$0xff]  ;;  %v3101_v61 = vld [vmem:[%s4213_s7 + $0x68] sm:$0xff] }
 0x6b9   : > { %1508 = vadd.xlane.f32.xlu0 %v3095_v28 }
 0x6c1   : > { %v3744_v29 = vpop.eup %3743 }
 0x6c2   : > { %v3746_v62 = vpop.eup %3745  ;;  %v1490_v6 = vadd.f32 1.0, %v3744_v29 }
 0x6c3   : > { %v1497_v63 = vadd.f32 1.0, %v3746_v62 }
 0x6c4   : > { %3747 = vrcp.f32 %v1490_v6 }
 0x6c5   : > { %3749 = vrcp.f32 %v1497_v63 }
 0x6c6   : > { %3751 = vtanh.f32 %v4452_v18 }
 0x6ce   : > { %v4461_v0 = vpop.eup %3747 }
 0x6cf   : > { %1500 = vrot.lane.b32.xlu0 %v4461_v0, %s4001_s24  ;;  %v3750_v1 = vpop.eup %3749 }
 0x6d0   : > { %v3752_v7 = vpop.eup %3751 }
 0x6d1   : > { %v1537_v11 = vmul.f32 %v3752_v7, %v4461_v0 }
 0x6d3   : > { %1502 = vrot.lane.b32.xlu0 %v3750_v1, %s4001_s24 }
 0x745   : > { %v1521_v46 = vpop.xlane.xlu1 %1520 }
 0x746   : > { %v1522_v47 = vrot.slane %v1521_v46, 4  ;;  %v1509_v48 = vpop.xlane.xlu0 %1508 }
 0x747   : > { %v1510_v49 = vrot.slane %v1509_v48, 4 }
 0x748   : > { %v1523_v50 = vadd.f32 %v1522_v47, %v1521_v46 }
 0x749   : > { %v1511_v51 = vadd.f32 %v1510_v49, %v1509_v48 }
 0x74a   : > { %v1524_v52 = vrot.slane %v1523_v50, 2  ;;  %v1501_v9 = vpop.permute.xlu0 %1500 }
 0x74b   : > { %v1512_v53 = vrot.slane %v1511_v51, 2  ;;  %v1547_v15 = vmul.f32 %v1501_v9, %v4442_v54  ;;  %v3100_v54 = vld [vmem:[%s4213_s7 + $0x60] sm:$0xff] }
 0x74c   : > { %v1525_v55 = vadd.f32 %v1524_v52, %v1523_v50  ;;  %v3683_v52 = vld [vmem:[#allocation6 + $0x8] ss:$12 sps:$4 sm:$0xff]  }
 0x74d   : > { %v1513_v57 = vadd.f32 %v1512_v53, %v1511_v51  ;;  %v3684_v53 = vld [vmem:[#allocation6 + $0x20] ss:$12 sps:$4 sm:$0xff]  }
 0x74e   : > { %v1526_v58 = vrot.slane %v1525_v55, 1  ;;  %v1503_v24 = vpop.permute.xlu0 %1502 }
 0x74f   : > { %v1514_v59 = vrot.slane %v1513_v57, 1 }
 0x750   : > { %v1527_v56 = vadd.f32 %v1526_v58, %v1525_v55  ;;  %v3685_v55 = vld [vmem:[#allocation6 + $0x38] ss:$12 sps:$4 sm:$0xff]   ;;  %v3687_v58 = vld [vmem:[#allocation6 + $0x68] ss:$12 sps:$4 sm:$0xff]  }
 0x751   : > { %v1515_v60 = vadd.f32 %v1514_v59, %v1513_v57  ;;  %v3686_v57 = vld [vmem:[#allocation6 + $0x50] ss:$12 sps:$4 sm:$0xff]   ;;  %v3688_v59 = vld [vmem:[#allocation6 + $0x80] ss:$12 sps:$4 sm:$0xff]  }
 0x753   : > { %3491 = vpush %v1515_v60  ;;  %v3690_v60 = vld [vmem:[#allocation6 + $0xb0] ss:$12 sps:$4 sm:$0xff]  }
 0x754   : > { %3493 = vpush %v1527_v56  ;;  %v3689_v56 = vld [vmem:[#allocation6 + $0x98] ss:$12 sps:$4 sm:$0xff]  }
 0x784   : > { %s3492_s28 = spop %3491 }
 0x785   : > { %p1530_p10 = scmp.gt.f32.partialorder %s3492_s28, 4.0  ;;  %p1534_p13 = scmp.lt.f32.partialorder %s3492_s28, 4.0 }
 0x786   : > { %s3494_s23 = spop %3493 }
 0x787   : > { %p1529_p2 = scmp.lt.f32.partialorder %s3494_s23, 4.0  ;;  %p1533_p0 = scmp.gt.f32.partialorder %s3494_s23, 4.0 }
 0x789   : > { %p1531_p6 = pnand %p1530_p10, %p1529_p2  ;;  %p1535_p8 = pnand %p1534_p13, %p1533_p0 }
 0x78b   : > { %s3097_s27 = scalar_select %p1535_p8, 0, 1 }
 0x78c   : > { %s3098_s8 = scalar_select %p1531_p6, 0, 1 }
 0x78d   : > { %v1539_v12 = vstv %s3097_s27 }
 0x78e   : > { %vm1540_vm8 = vcmp.eq.s32.totalorder %v1539_v12, 1  ;;  %v1543_v14 = vstv %s3098_s8 }
 0x78f   : > { %v1541_v17 = vsel %vm1540_vm8, %v3752_v7, %v1537_v11  ;;  %vm1544_vm9 = vcmp.eq.s32.totalorder %v1543_v14, 1 }
 0x790   : > { %v1545_v18 = vsel %vm1544_vm9, %v4461_v0, %v1541_v17 }
 0x791   : > { %v4527_v20 = vadd.f32 %v1547_v15, %v1545_v18 }
 0x793   : > { %3753 = vtanh.f32 %v4527_v20 }
 0x79d   : > { %v3754_v21 = vpop.eup %3753 }
 0x79e   : > { %v1550_v42 = vmul.f32 %v3754_v21, %v1503_v24 }
 0x7a0   : > { %3099 = vst [vmem:[%s4224_s30 + $0x18] sm:$0xff] %v1550_v42  ;;  %v1556_v25 = vpack.c.bf16 %v1550_v42, %v1550_v42 }
 0x7a2   : > { %1754 = vmatmul.mubr.bf16.vlgmr.msra.gmra.mrb[16].mxu0 %v1556_v25  ;;  %3413 = vmatmul.mubr.bf16.vlgmr.msra.gmra.mrb[16].mxu1 %v1556_v25 }
 0x7a3   : > { %2040 = vmatpush1.bf16.msra.mxu0 %v4468_v4  ;;  %2071 = vmatprep.mubr.bf16.mxu0 %v4000_v8 }
 0x7a4   : > { %2041 = vmatprep.subr.bf16.mxu0 %v4472_v10  ;;  %3432 = vmatprep.mubr.msk.bf16.mxu1 %vm3999_vm0, %v3998_v2 }
 0x7a5   : > { %3417 = vmatpush3.bf16.msra.mxu1 %v3683_v52 }
 0x7a6   : > { %3418 = vmatprep.subr.bf16.mxu1 %v3998_v2 }
 0x7a7   : > { %2042 = vmatpush1.bf16.msra.mxu0 %v4475_v13 }
 0x7a8   : > { %2043 = vmatprep.subr.bf16.mxu0 %v4479_v19 }
 0x7a9   : > { %3419 = vmatpush3.bf16.msra.mxu1 %v3684_v53 }
 0x7aa   : > { %3420 = vmatprep.subr.bf16.mxu1 %v3998_v2 }
 0x7ab   : > { %2044 = vmatpush1.bf16.msra.mxu0 %v4482_v22 }
 0x7ac   : > { %2045 = vmatprep.subr.bf16.mxu0 %v4486_v26 }
 0x7ad   : > { %3421 = vmatpush3.bf16.msra.mxu1 %v3685_v55 }
 0x7ae   : > { %3422 = vmatprep.subr.bf16.mxu1 %v3998_v2 }
 0x7af   : > { %2046 = vmatpush1.bf16.msra.mxu0 %v4489_v30 }
 0x7b0   : > { %2047 = vmatprep.subr.bf16.mxu0 %v4493_v33 }
 0x7b1   : > { %3423 = vmatpush3.bf16.msra.mxu1 %v3686_v57 }
 0x7b2   : > { %3424 = vmatprep.subr.bf16.mxu1 %v3998_v2 }
 0x7b3   : > { %2048 = vmatpush1.bf16.msra.mxu0 %v4496_v34 }
 0x7b4   : > { %2049 = vmatprep.subr.bf16.mxu0 %v4500_v36 }
 0x7b5   : > { %3425 = vmatpush3.bf16.msra.mxu1 %v3687_v58 }
 0x7b6   : > { %3426 = vmatprep.subr.bf16.mxu1 %v3998_v2 }
 0x7b7   : > { %2050 = vmatpush1.bf16.msra.mxu0 %v4503_v37 }
 0x7b8   : > { %2051 = vmatprep.subr.bf16.mxu0 %v4507_v39 }
 0x7b9   : > { %3427 = vmatpush3.bf16.msra.mxu1 %v3688_v59 }
 0x7ba   : > { %3428 = vmatprep.subr.bf16.mxu1 %v3998_v2 }
 0x7bb   : > { %2052 = vmatpush1.bf16.msra.mxu0 %v4510_v40 }
 0x7bc   : > { %2053 = vmatprep.subr.bf16.mxu0 %v4514_v43 }
 0x7bd   : > { %3429 = vmatpush3.bf16.msra.mxu1 %v3689_v56 }
 0x7be   : > { %3430 = vmatprep.subr.bf16.mxu1 %v3998_v2 }
 0x7bf   : > { %2054 = vmatpush1.bf16.msra.mxu0 %v4517_v44 }
 0x7c0   : > { %2357 = vmatprep.subr.bf16.mxu0 %v4466_v3 }
 0x7c1   : > { %3431 = vmatpush3.bf16.msra.mxu1 %v3690_v60 }
 0x7c2   : > { %3436 = vmatprep.subr.bf16.mxu1 %v3998_v2 }
 0x875   : > { %v1755_v28 = vpop.f32.mrb[16].mxu0  ;;  %v1796_v29 = vpop.f32.mrb[16].mxu1 }
 0x876   : > { %v1802_v62 = vadd.f32 %v3100_v54, %v1755_v28  ;;  %v1804_v6 = vadd.f32 %v3102_v27, %v1796_v29  ;;  %v1757_v63 = vpop.f32.mrb[17].mxu0  ;;  %v3414_v0 = vpop.f32.mrb[17].mxu1 }
 0x877   : > { %v4553_v1 = vadd.f32 %v3101_v61, %v1757_v63  ;;  %v1759_v5 = vpop.f32.mrb[18].mxu0  ;;  %v1799_v16 = vpop.f32.mrb[18].mxu1 }
 0x878   : > { %v3127_v23 = vmul.f32 -1.442695, %v1802_v62  ;;  %vm1822_vm10 = vcmp.gt.f32.partialorder %v1804_v6, 0.0  ;;  %v1760_v32 = vpop.f32.mrb[19].mxu0  ;;  %v3415_v35 = vpop.f32.mrb[19].mxu1 }
 0x879   : > { %v3128_v38 = vmul.f32 -1.442695, %v4553_v1  ;;  %vm1835_vm11 = vmand %vm1822_vm10, %vm284_vm3 }
 0x87a   : > { %3755 = vpow2.f32 %v3127_v23  ;;  %v3130_v41 = vsel %vm1835_vm11, 1.0, %v3998_v2  ;;  %vm1823_vm12 = vmand %vm1822_vm10, %vm283_vm1 }
 0x87b   : > { %3757 = vpow2.f32 %v3128_v38  ;;  %1838 = vadd.xlane.f32.xlu1 %v3130_v41  ;;  %v3129_v45 = vsel %vm1823_vm12, 1.0, %v3998_v2  ;;  %v3136_v38 = vld [vmem:[%s4213_s7 + $0x88] sm:$0xff]  ;;  %v3135_v41 = vld [vmem:[%s4213_s7 + $0x80] sm:$0xff] }
 0x87c   : > { %1826 = vadd.xlane.f32.xlu0 %v3129_v45 }
 0x884   : > { %v3756_v46 = vpop.eup %3755 }
 0x885   : > { %v3758_v47 = vpop.eup %3757  ;;  %v1808_v48 = vadd.f32 1.0, %v3756_v46 }
 0x886   : > { %v1815_v49 = vadd.f32 1.0, %v3758_v47 }
 0x887   : > { %3759 = vrcp.f32 %v1808_v48 }
 0x888   : > { %3761 = vrcp.f32 %v1815_v49 }
 0x889   : > { %3763 = vtanh.f32 %v4553_v1 }
 0x891   : > { %v4562_v50 = vpop.eup %3759 }
 0x892   : > { %1818 = vrot.lane.b32.xlu1 %v4562_v50, %s4001_s24  ;;  %v3762_v51 = vpop.eup %3761 }
 0x893   : > { %v3764_v61 = vpop.eup %3763 }
 0x894   : > { %v1855_v29 = vmul.f32 %v3764_v61, %v4562_v50 }
 0x896   : > { %1820 = vrot.lane.b32.xlu1 %v3762_v51, %s4001_s24 }
 0x908   : > { %v1839_v7 = vpop.xlane.xlu1 %1838 }
 0x909   : > { %v1840_v9 = vrot.slane %v1839_v7, 4  ;;  %v1827_v11 = vpop.xlane.xlu0 %1826 }
 0x90a   : > { %v1828_v12 = vrot.slane %v1827_v11, 4 }
 0x90b   : > { %v1841_v14 = vadd.f32 %v1840_v9, %v1839_v7 }
 0x90c   : > { %v1829_v15 = vadd.f32 %v1828_v12, %v1827_v11  ;;  %v1819_v28 = vpop.permute.xlu1 %1818 }
 0x90d   : > { %v1842_v17 = vrot.slane %v1841_v14, 2  ;;  %v1865_v63 = vmul.f32 %v1819_v28, %v4527_v20  ;;  %v3134_v20 = vld [vmem:[%s4213_s7 + $0x78] sm:$0xff] }
 0x90e   : > { %v1830_v18 = vrot.slane %v1829_v15, 2 }
 0x90f   : > { %v1843_v21 = vadd.f32 %v1842_v17, %v1841_v14  ;;  %v3692_v17 = vld [vmem:[#allocation6 + $0x20] ss:$12 sps:$4 sm:$0xff]  }
 0x910   : > { %v1831_v24 = vadd.f32 %v1830_v18, %v1829_v15  ;;  %v1821_v23 = vpop.permute.xlu1 %1820  ;;  %v3691_v15 = vld [vmem:[#allocation6 + $0x8] ss:$12 sps:$4 sm:$0xff]   ;;  %v3693_v18 = vld [vmem:[#allocation6 + $0x38] ss:$12 sps:$4 sm:$0xff]  }
 0x911   : > { %v1844_v42 = vrot.slane %v1843_v21, 1 }
 0x912   : > { %v1832_v25 = vrot.slane %v1831_v24, 1 }
 0x913   : > { %v1845_v54 = vadd.f32 %v1844_v42, %v1843_v21  ;;  %v3694_v21 = vld [vmem:[#allocation6 + $0x50] ss:$12 sps:$4 sm:$0xff]   ;;  %v3696_v42 = vld [vmem:[#allocation6 + $0x80] ss:$12 sps:$4 sm:$0xff]  }
 0x914   : > { %v1833_v27 = vadd.f32 %v1832_v25, %v1831_v24  ;;  %v3695_v24 = vld [vmem:[#allocation6 + $0x68] ss:$12 sps:$4 sm:$0xff]   ;;  %v3697_v25 = vld [vmem:[#allocation6 + $0x98] ss:$12 sps:$4 sm:$0xff]  }
 0x916   : > { %3495 = vpush %v1833_v27 }
 0x917   : > { %3497 = vpush %v1845_v54  ;;  %v3698_v54 = vld [vmem:[#allocation6 + $0xb0] ss:$12 sps:$4 sm:$0xff]  }
 0x947   : > { %s3496_s10 = spop %3495 }
 0x948   : > { %p1848_p4 = scmp.gt.f32.partialorder %s3496_s10, 4.0  ;;  %p1852_p5 = scmp.lt.f32.partialorder %s3496_s10, 4.0 }
 0x949   : > { %s3498_s12 = spop %3497 }
 0x94a   : > { %p1847_p9 = scmp.lt.f32.partialorder %s3498_s12, 4.0  ;;  %p1851_p12 = scmp.gt.f32.partialorder %s3498_s12, 4.0 }
 0x94c   : > { %p1849_p3 = pnand %p1848_p4, %p1847_p9  ;;  %p1853_p1 = pnand %p1852_p5, %p1851_p12 }
 0x94e   : > { %s3131_s13 = scalar_select %p1853_p1, 0, 1 }
 0x94f   : > { %s3132_s15 = scalar_select %p1849_p3, 0, 1 }
 0x950   : > { %v1857_v62 = vstv %s3131_s13  ;;  %s4002_s13 = smov [#allocation10]  }
 0x951   : > { %vm1858_vm13 = vcmp.eq.s32.totalorder %v1857_v62, 1  ;;  %v1861_v6 = vstv %s3132_s15  ;;  %s2855_s15 = sshll.u32 %s4002_s13, 4  ;;  %s2856_s15 = int_to_ptr.vmem [resolvable:$true] %s2855_s15 }
 0x952   : > { %v1859_v0 = vsel %vm1858_vm13, %v3764_v61, %v1855_v29  ;;  %vm1862_vm14 = vcmp.eq.s32.totalorder %v1861_v6, 1 }
 0x953   : > { %v1863_v1 = vsel %vm1862_vm14, %v4562_v50, %v1859_v0 }
 0x954   : > { %v4579_v5 = vadd.f32 %v1865_v63, %v1863_v1 }
 0x956   : > { %3765 = vtanh.f32 %v4579_v5 }
 0x960   : > { %v3766_v16 = vpop.eup %3765 }
 0x961   : > { %v1868_v32 = vmul.f32 %v3766_v16, %v1821_v23 }
 0x963   : > { %3133 = vst [vmem:[%s4224_s30 + $0x20] sm:$0xff] %v1868_v32  ;;  %v1874_v35 = vpack.c.bf16 %v1868_v32, %v1868_v32 }
 0x965   : > { %2072 = vmatmul.mubr.bf16.vlgmr.msra.gmra.mrb[20].mxu0 %v1874_v35  ;;  %3433 = vmatmul.mubr.bf16.vlgmr.msra.gmra.mrb[20].mxu1 %v1874_v35 }
 0x966   : > { %2358 = vmatpush1.bf16.msra.mxu0 %v4468_v4  ;;  %2389 = vmatprep.mubr.bf16.mxu0 %v4000_v8 }
 0x967   : > { %2359 = vmatprep.subr.bf16.mxu0 %v4472_v10  ;;  %3452 = vmatprep.mubr.msk.bf16.mxu1 %vm3999_vm0, %v3998_v2 }
 0x968   : > { %3437 = vmatpush3.bf16.msra.mxu1 %v3691_v15  ;;  %v3702_v15 = vld [vmem:[#allocation6 + $0x50] ss:$12 sps:$4 sm:$0xff]  }
 0x969   : > { %3438 = vmatprep.subr.bf16.mxu1 %v3998_v2 }
 0x96a   : > { %2360 = vmatpush1.bf16.msra.mxu0 %v4475_v13 }
 0x96b   : > { %2361 = vmatprep.subr.bf16.mxu0 %v4479_v19 }
 0x96c   : > { %3439 = vmatpush3.bf16.msra.mxu1 %v3692_v17  ;;  %v3703_v17 = vld [vmem:[#allocation6 + $0x68] ss:$12 sps:$4 sm:$0xff]  }
 0x96d   : > { %3440 = vmatprep.subr.bf16.mxu1 %v3998_v2 }
 0x96e   : > { %2362 = vmatpush1.bf16.msra.mxu0 %v4482_v22 }
 0x96f   : > { %2363 = vmatprep.subr.bf16.mxu0 %v4486_v26 }
 0x970   : > { %3441 = vmatpush3.bf16.msra.mxu1 %v3693_v18  ;;  %v3704_v18 = vld [vmem:[#allocation6 + $0x80] ss:$12 sps:$4 sm:$0xff]  }
 0x971   : > { %3442 = vmatprep.subr.bf16.mxu1 %v3998_v2 }
 0x972   : > { %2364 = vmatpush1.bf16.msra.mxu0 %v4489_v30 }
 0x973   : > { %2365 = vmatprep.subr.bf16.mxu0 %v4493_v33 }
 0x974   : > { %3443 = vmatpush3.bf16.msra.mxu1 %v3694_v21  ;;  %v3705_v21 = vld [vmem:[#allocation6 + $0x98] ss:$12 sps:$4 sm:$0xff]  }
 0x975   : > { %3444 = vmatprep.subr.bf16.mxu1 %v3998_v2 }
 0x976   : > { %2366 = vmatpush1.bf16.msra.mxu0 %v4496_v34 }
 0x977   : > { %2367 = vmatprep.subr.bf16.mxu0 %v4500_v36 }
 0x978   : > { %3445 = vmatpush3.bf16.msra.mxu1 %v3695_v24  ;;  %v3706_v24 = vld [vmem:[#allocation6 + $0xb0] ss:$12 sps:$4 sm:$0xff]  }
 0x979   : > { %3446 = vmatprep.subr.bf16.mxu1 %v3998_v2 }
 0x97a   : > { %2368 = vmatpush1.bf16.msra.mxu0 %v4503_v37 }
 0x97b   : > { %2369 = vmatprep.subr.bf16.mxu0 %v4507_v39 }
 0x97c   : > { %3447 = vmatpush3.bf16.msra.mxu1 %v3696_v42 }
 0x97d   : > { %3448 = vmatprep.subr.bf16.mxu1 %v3998_v2 }
 0x97e   : > { %2370 = vmatpush1.bf16.msra.mxu0 %v4510_v40 }
 0x97f   : > { %2371 = vmatprep.subr.bf16.mxu0 %v4514_v43 }
 0x980   : > { %3449 = vmatpush3.bf16.msra.mxu1 %v3697_v25 }
 0x981   : > { %3450 = vmatprep.subr.bf16.mxu1 %v3998_v2 }
 0x982   : > { %2372 = vmatpush1.bf16.msra.mxu0 %v4517_v44 }
 0x983   : > { %2675 = vmatprep.subr.bf16.mxu0 %v4466_v3 }
 0x984   : > { %3451 = vmatpush3.bf16.msra.mxu1 %v3698_v54 }
 0x985   : > { %3456 = vmatprep.subr.bf16.mxu1 %v3998_v2 }
 0xa38   : > { %v2073_v45 = vpop.f32.mrb[20].mxu0  ;;  %v2114_v46 = vpop.f32.mrb[20].mxu1 }
 0xa39   : > { %v2120_v47 = vadd.f32 %v3134_v20, %v2073_v45  ;;  %v2122_v48 = vadd.f32 %v3136_v38, %v2114_v46  ;;  %v2075_v49 = vpop.f32.mrb[21].mxu0  ;;  %v3434_v50 = vpop.f32.mrb[21].mxu1 }
 0xa3a   : > { %v4605_v51 = vadd.f32 %v3135_v41, %v2075_v49  ;;  %v2077_v52 = vpop.f32.mrb[22].mxu0  ;;  %v2117_v53 = vpop.f32.mrb[22].mxu1 }
 0xa3b   : > { %v3161_v55 = vmul.f32 -1.442695, %v2120_v47  ;;  %vm2140_vm15 = vcmp.gt.f32.partialorder %v2122_v48, 0.0  ;;  %v2078_v57 = vpop.f32.mrb[23].mxu0  ;;  %v3435_v58 = vpop.f32.mrb[23].mxu1 }
 0xa3c   : > { %v3162_v59 = vmul.f32 -1.442695, %v4605_v51  ;;  %vm2153_vm2 = vmand %vm2140_vm15, %vm284_vm3 }
 0xa3d   : > { %3767 = vpow2.f32 %v3161_v55  ;;  %v3164_v3 = vsel %vm2153_vm2, 1.0, %v3998_v2  ;;  %vm2141_vm4 = vmand %vm2140_vm15, %vm283_vm1 }
 0xa3e   : > { %3769 = vpow2.f32 %v3162_v59  ;;  %2156 = vadd.xlane.f32.xlu1 %v3164_v3  ;;  %v3163_v56 = vsel %vm2141_vm4, 1.0, %v3998_v2 }
 0xa3f   : > { %2144 = vadd.xlane.f32.xlu0 %v3163_v56 }
 0xa47   : > { %v3768_v60 = vpop.eup %3767 }
 0xa48   : > { %v3770_v7 = vpop.eup %3769  ;;  %v2126_v9 = vadd.f32 1.0, %v3768_v60 }
 0xa49   : > { %v2133_v11 = vadd.f32 1.0, %v3770_v7 }
 0xa4a   : > { %3771 = vrcp.f32 %v2126_v9 }
 0xa4b   : > { %3773 = vrcp.f32 %v2133_v11  ;;  %v3699_v11 = vld [vmem:[#allocation6 + $0x8] ss:$12 sps:$4 sm:$0xff]  }
 0xa4c   : > { %3775 = vtanh.f32 %v4605_v51 }
 0xa54   : > { %v4614_v12 = vpop.eup %3771 }
 0xa55   : > { %2136 = vrot.lane.b32.xlu0 %v4614_v12, %s4001_s24  ;;  %v3774_v14 = vpop.eup %3773 }
 0xa56   : > { %v3776_v38 = vpop.eup %3775 }
 0xa57   : > { %v2173_v45 = vmul.f32 %v3776_v38, %v4614_v12 }
 0xa59   : > { %2138 = vrot.lane.b32.xlu0 %v3774_v14, %s4001_s24  ;;  %v3701_v14 = vld [vmem:[#allocation6 + $0x38] ss:$12 sps:$4 sm:$0xff]  }
 0xacb   : > { %v2157_v27 = vpop.xlane.xlu1 %2156 }
 0xacc   : > { %v2158_v61 = vrot.slane %v2157_v27, 4  ;;  %v2145_v28 = vpop.xlane.xlu0 %2144 }
 0xacd   : > { %v2146_v29 = vrot.slane %v2145_v28, 4 }
 0xace   : > { %v2159_v62 = vadd.f32 %v2158_v61, %v2157_v27 }
 0xacf   : > { %v2147_v6 = vadd.f32 %v2146_v29, %v2145_v28 }
 0xad0   : > { %v2160_v63 = vrot.slane %v2159_v62, 2  ;;  %v2137_v41 = vpop.permute.xlu0 %2136 }
 0xad1   : > { %v2148_v0 = vrot.slane %v2147_v6, 2  ;;  %v2183_v48 = vmul.f32 %v2137_v41, %v4579_v5 }
 0xad2   : > { %v2161_v1 = vadd.f32 %v2160_v63, %v2159_v62 }
 0xad3   : > { %v2149_v16 = vadd.f32 %v2148_v0, %v2147_v6 }
 0xad4   : > { %v2162_v23 = vrot.slane %v2161_v1, 1  ;;  %v2139_v53 = vpop.permute.xlu0 %2138 }
 0xad5   : > { %v2150_v32 = vrot.slane %v2149_v16, 1 }
 0xad6   : > { %v2163_v35 = vadd.f32 %v2162_v23, %v2161_v1 }
 0xad7   : > { %v2151_v20 = vadd.f32 %v2150_v32, %v2149_v16 }
 0xad9   : > { %3499 = vpush %v2151_v20 }
 0xada   : > { %3501 = vpush %v2163_v35 }
 0xb0a   : > { %s3500_s6 = spop %3499 }
 0xb0b   : > { %p2166_p11 = scmp.gt.f32.partialorder %s3500_s6, 4.0  ;;  %p2170_p7 = scmp.lt.f32.partialorder %s3500_s6, 4.0 }
 0xb0c   : > { %s3502_s26 = spop %3501  ;;  %s3889_s6 = scalar_lea.vmem %s2856_s15, 128 }
 0xb0d   : > { %p2165_p10 = scmp.lt.f32.partialorder %s3502_s26, 4.0  ;;  %p2169_p13 = scmp.gt.f32.partialorder %s3502_s26, 4.0 }
 0xb0f   : > { %p2167_p2 = pnand %p2166_p11, %p2165_p10  ;;  %p2171_p0 = pnand %p2170_p7, %p2169_p13 }
 0xb11   : > { %s3165_s9 = scalar_select %p2171_p0, 0, 1 }
 0xb12   : > { %s3166_s11 = scalar_select %p2167_p2, 0, 1 }
 0xb13   : > { %v2175_v46 = vstv %s3165_s9  ;;  %p3890_p2 = scmp.ne.s32.totalorder %s2856_s15, %s3889_s6  ;;  %p4791_p0 = scmp.eq.s32.totalorder %s4057_s22, 1 }
 0xb14   : > { %vm2176_vm5 = vcmp.eq.s32.totalorder %v2175_v46, 1  ;;  %v2179_v47 = vstv %s3166_s11 }
 0xb15   : > { %v2177_v49 = vsel %vm2176_vm5, %v3776_v38, %v2173_v45  ;;  %vm2180_vm6 = vcmp.eq.s32.totalorder %v2179_v47, 1 }
 0xb16   : > { %v2181_v50 = vsel %vm2180_vm6, %v4614_v12, %v2177_v49  ;;  %v3700_v12 = vld [vmem:[#allocation6 + $0x20] ss:$12 sps:$4 sm:$0xff]  }
 0xb17   : > { %v4631_v51 = vadd.f32 %v2183_v48, %v2181_v50 }
 0xb19   : > { %3777 = vtanh.f32 %v4631_v51 }
 0xb23   : > { %v3778_v52 = vpop.eup %3777 }
 0xb24   : > { %v2186_v55 = vmul.f32 %v3778_v52, %v2139_v53 }
 0xb26   : > { %3167 = vst [vmem:[%s4224_s30 + $0x28] sm:$0xff] %v2186_v55  ;;  %v2192_v57 = vpack.c.bf16 %v2186_v55, %v2186_v55  ;;  %v3202_v55 = vld [vmem:[%s4213_s7 + $0xa8] sm:$0xff] }
 0xb28   : > { %2390 = vmatmul.mubr.bf16.vlgmr.msra.gmra.mrb[24].mxu0 %v2192_v57  ;;  %3453 = vmatmul.mubr.bf16.vlgmr.msra.gmra.mrb[24].mxu1 %v2192_v57  ;;  %v3204_v57 = vld [vmem:[%s4213_s7 + $0xb8] sm:$0xff] }
 0xb29   : > { %2676 = vmatpush1.bf16.msra.mxu0 %v4468_v4  ;;  %2707 = vmatprep.mubr.bf16.mxu0 %v4000_v8  ;;  %v3168_v8 = vld [vmem:[%s4213_s7 + $0x90] sm:$0xff]  ;;  %v3170_v4 = vld [vmem:[%s4213_s7 + $0xa0] sm:$0xff] }
 0xb2a   : > { %2677 = vmatprep.subr.bf16.mxu0 %v4472_v10  ;;  %3472 = vmatprep.mubr.msk.bf16.mxu1 %vm3999_vm0, %v3998_v2  ;;  %v3169_v10 = vld [vmem:[%s4213_s7 + $0x98] sm:$0xff] }
 0xb2b   : > { %3457 = vmatpush3.bf16.msra.mxu1 %v3699_v11 }
 0xb2c   : > { %3458 = vmatprep.subr.bf16.mxu1 %v3998_v2 }
 0xb2d   : > { %2678 = vmatpush1.bf16.msra.mxu0 %v4475_v13 }
 0xb2e   : > { %2679 = vmatprep.subr.bf16.mxu0 %v4479_v19 }
 0xb2f   : > { %3459 = vmatpush3.bf16.msra.mxu1 %v3700_v12 }
 0xb30   : > { %3460 = vmatprep.subr.bf16.mxu1 %v3998_v2 }
 0xb31   : > { %2680 = vmatpush1.bf16.msra.mxu0 %v4482_v22 }
 0xb32   : > { %2681 = vmatprep.subr.bf16.mxu0 %v4486_v26 }
 0xb33   : > { %3461 = vmatpush3.bf16.msra.mxu1 %v3701_v14 }
 0xb34   : > { %3462 = vmatprep.subr.bf16.mxu1 %v3998_v2 }
 0xb35   : > { %2682 = vmatpush1.bf16.msra.mxu0 %v4489_v30 }
 0xb36   : > { %2683 = vmatprep.subr.bf16.mxu0 %v4493_v33 }
 0xb37   : > { %3463 = vmatpush3.bf16.msra.mxu1 %v3702_v15 }
 0xb38   : > { %3464 = vmatprep.subr.bf16.mxu1 %v3998_v2 }
 0xb39   : > { %2684 = vmatpush1.bf16.msra.mxu0 %v4496_v34 }
 0xb3a   : > { %2685 = vmatprep.subr.bf16.mxu0 %v4500_v36 }
 0xb3b   : > { %3465 = vmatpush3.bf16.msra.mxu1 %v3703_v17 }
 0xb3c   : > { %3466 = vmatprep.subr.bf16.mxu1 %v3998_v2 }
 0xb3d   : > { %2686 = vmatpush1.bf16.msra.mxu0 %v4503_v37 }
 0xb3e   : > { %2687 = vmatprep.subr.bf16.mxu0 %v4507_v39 }
 0xb3f   : > { %3467 = vmatpush3.bf16.msra.mxu1 %v3704_v18 }
 0xb40   : > { %3468 = vmatprep.subr.bf16.mxu1 %v3998_v2 }
 0xb41   : > { %2688 = vmatpush1.bf16.msra.mxu0 %v4510_v40 }
 0xb42   : > { %2689 = vmatprep.subr.bf16.mxu0 %v4514_v43 }
 0xb43   : > { %3469 = vmatpush3.bf16.msra.mxu1 %v3705_v21 }
 0xb44   : > { %3470 = vmatprep.subr.bf16.mxu1 %v3998_v2 }
 0xb45   : > { %2690 = vmatpush1.bf16.msra.mxu0 %v4517_v44 }
 0xb47   : > { %3471 = vmatpush3.bf16.msra.mxu1 %v3706_v24 }
 0xbfb   : > { %v2391_v13 = vpop.f32.mrb[24].mxu0  ;;  %v2432_v19 = vpop.f32.mrb[24].mxu1 }
 0xbfc   : > { %v2438_v22 = vadd.f32 %v3168_v8, %v2391_v13  ;;  %v2440_v26 = vadd.f32 %v3170_v4, %v2432_v19  ;;  %v2393_v30 = vpop.f32.mrb[25].mxu0  ;;  %v3454_v33 = vpop.f32.mrb[25].mxu1  ;;  %v3203_v8 = vld [vmem:[%s4213_s7 + $0xb0] sm:$0xff] }
 0xbfd   : > { %v4656_v34 = vadd.f32 %v3169_v10, %v2393_v30  ;;  %v2395_v36 = vpop.f32.mrb[26].mxu0  ;;  %v2435_v37 = vpop.f32.mrb[26].mxu1 }
 0xbfe   : > { %v3195_v39 = vmul.f32 -1.442695, %v2438_v22  ;;  %vm2458_vm0 = vcmp.gt.f32.partialorder %v2440_v26, 0.0  ;;  %v2396_v40 = vpop.f32.mrb[27].mxu0  ;;  %v3455_v5 = vpop.f32.mrb[27].mxu1 }
 0xbff   : > { %v3196_v43 = vmul.f32 -1.442695, %v4656_v34  ;;  %vm2471_vm7 = vmand %vm2458_vm0, %vm284_vm3 }
 0xc00   : > { %3779 = vpow2.f32 %v3195_v39  ;;  %v3198_v44 = vsel %vm2471_vm7, 1.0, %v3998_v2  ;;  %vm2459_vm8 = vmand %vm2458_vm0, %vm283_vm1 }
 0xc01   : > { %3781 = vpow2.f32 %v3196_v43  ;;  %2474 = vadd.xlane.f32.xlu1 %v3198_v44  ;;  %v3197_v58 = vsel %vm2459_vm8, 1.0, %v3998_v2 }
 0xc02   : > { %2462 = vadd.xlane.f32.xlu0 %v3197_v58 }
 0xc0a   : > { %v3780_v59 = vpop.eup %3779 }
 0xc0b   : > { %v3782_v3 = vpop.eup %3781  ;;  %v2444_v56 = vadd.f32 1.0, %v3780_v59 }
 0xc0c   : > { %v2451_v60 = vadd.f32 1.0, %v3782_v3 }
 0xc0d   : > { %3783 = vrcp.f32 %v2444_v56 }
 0xc0e   : > { %3785 = vrcp.f32 %v2451_v60 }
 0xc0f   : > { %3787 = vtanh.f32 %v4656_v34 }
 0xc17   : > { %v4665_v7 = vpop.eup %3783 }
 0xc18   : > { %2454 = vrot.lane.b32.xlu1 %v4665_v7, %s4001_s24  ;;  %v3786_v9 = vpop.eup %3785 }
 0xc19   : > { %v3788_v32 = vpop.eup %3787 }
 0xc1a   : > { %v2491_v20 = vmul.f32 %v3788_v32, %v4665_v7 }
 0xc1c   : > { %2456 = vrot.lane.b32.xlu1 %v3786_v9, %s4001_s24 }
 0xc8e   : > { %v2475_v42 = vpop.xlane.xlu1 %2474 }
 0xc8f   : > { %v2476_v25 = vrot.slane %v2475_v42, 4  ;;  %v2463_v54 = vpop.xlane.xlu0 %2462 }
 0xc90   : > { %v2464_v27 = vrot.slane %v2463_v54, 4 }
 0xc91   : > { %v2477_v61 = vadd.f32 %v2476_v25, %v2475_v42 }
 0xc92   : > { %v2465_v28 = vadd.f32 %v2464_v27, %v2463_v54  ;;  %v2455_v35 = vpop.permute.xlu1 %2454 }
 0xc93   : > { %v2478_v29 = vrot.slane %v2477_v61, 2  ;;  %v2501_v45 = vmul.f32 %v2455_v35, %v4631_v51 }
 0xc94   : > { %v2466_v62 = vrot.slane %v2465_v28, 2 }
 0xc95   : > { %v2479_v6 = vadd.f32 %v2478_v29, %v2477_v61 }
 0xc96   : > { %v2467_v63 = vadd.f32 %v2466_v62, %v2465_v28  ;;  %v2457_v50 = vpop.permute.xlu1 %2456 }
 0xc97   : > { %v2480_v0 = vrot.slane %v2479_v6, 1 }
 0xc98   : > { %v2468_v1 = vrot.slane %v2467_v63, 1 }
 0xc99   : > { %v2481_v16 = vadd.f32 %v2480_v0, %v2479_v6 }
 0xc9a   : > { %v2469_v23 = vadd.f32 %v2468_v1, %v2467_v63 }
 0xc9c   : > { %3503 = vpush %v2469_v23 }
 0xc9d   : > { %3505 = vpush %v2481_v16 }
 0xccd   : > { %s3504_s28 = spop %3503 }
 0xcce   : > { %p2484_p6 = scmp.gt.f32.partialorder %s3504_s28, 4.0  ;;  %p2488_p8 = scmp.lt.f32.partialorder %s3504_s28, 4.0 }
 0xccf   : > { %s3506_s23 = spop %3505 }
 0xcd0   : > { %p2483_p4 = scmp.lt.f32.partialorder %s3506_s23, 4.0  ;;  %p2487_p5 = scmp.gt.f32.partialorder %s3506_s23, 4.0 }
 0xcd2   : > { %p2485_p9 = pnand %p2484_p6, %p2483_p4  ;;  %p2489_p12 = pnand %p2488_p8, %p2487_p5 }
 0xcd3   : > { %p3891_p6 = pnand %p3890_p2, %p4791_p0  ;;  %p3896_p4 = scmp.lt.s32.totalorder %s2856_s15, %s2856_s15 }
 0xcd4   : > { %s3199_s27 = scalar_select %p2489_p12, 0, 1 }
 0xcd5   : > { %s3200_s8 = scalar_select %p2485_p9, 0, 1 }
 0xcd6   : > { %v2493_v38 = vstv %s3199_s27  ;;  %p3892_p8 = pneg %p3891_p6  ;;  %p3897_p5 = scmp.lt.s32.totalorder %s3889_s6, %s3889_s6 }
 0xcd7   : > { %vm2494_vm9 = vcmp.eq.s32.totalorder %v2493_v38, 1  ;;  %v2497_v41 = vstv %s3200_s8 }
 0xcd8   : > { %v2495_v46 = vsel %vm2494_vm9, %v3788_v32, %v2491_v20  ;;  %vm2498_vm10 = vcmp.eq.s32.totalorder %v2497_v41, 1  ;;  %p3898_p9 = por %p3897_p5, %p3896_p4 }
 0xcd9   : > { %v2499_v47 = vsel %vm2498_vm10, %v4665_v7, %v2495_v46 }
 0xcda   : > { %v4681_v48 = vadd.f32 %v2501_v45, %v2499_v47  ;;  %p3899_p12 = pnand %p3898_p9, %p3892_p8 }
 0xcdc   : > { %3789 = vtanh.f32 %v4681_v48 }
 0xce6   : > { %v3790_v49 = vpop.eup %3789 }
 0xce7   : > { %v2504_v52 = vmul.f32 %v3790_v49, %v2457_v50 }
 0xce9   : > { %3201 = vst [vmem:[%s4224_s30 + $0x30] sm:$0xff] %v2504_v52  ;;  %v2510_v53 = vpack.c.bf16 %v2504_v52, %v2504_v52 }
 0xceb   : > { %2708 = vmatmul.mubr.bf16.vlgmr.msra.gmra.mrb[28].mxu0 %v2510_v53  ;;  %3473 = vmatmul.mubr.bf16.vlgmr.msra.gmra.mrb[28].mxu1 %v2510_v53 }
 0xdbe   : > { %v2709_v4 = vpop.f32.mrb[28].mxu0  ;;  %v2750_v51 = vpop.f32.mrb[28].mxu1 }
 0xdbf   : > { %v2756_v10 = vadd.f32 %v3202_v55, %v2709_v4  ;;  %v2758_v13 = vadd.f32 %v3204_v57, %v2750_v51  ;;  %v2711_v19 = vpop.f32.mrb[29].mxu0  ;;  %v3474_v22 = vpop.f32.mrb[29].mxu1 }
 0xdc0   : > { %v2757_v26 = vadd.f32 %v3203_v8, %v2711_v19  ;;  %v2713_v30 = vpop.f32.mrb[30].mxu0  ;;  %v2753_v33 = vpop.f32.mrb[30].mxu1 }
 0xdc1   : > { %v3229_v34 = vmul.f32 -1.442695, %v2756_v10  ;;  %vm2776_vm11 = vcmp.gt.f32.partialorder %v2758_v13, 0.0  ;;  %v2714_v36 = vpop.f32.mrb[31].mxu0  ;;  %v3475_v37 = vpop.f32.mrb[31].mxu1 }
 0xdc2   : > { %v3230_v39 = vmul.f32 -1.442695, %v2757_v26  ;;  %vm2789_vm12 = vmand %vm2776_vm11, %vm284_vm3 }
 0xdc3   : > { %3791 = vpow2.f32 %v3229_v34  ;;  %v3232_v40 = vsel %vm2789_vm12, 1.0, %v3998_v2  ;;  %vm2777_vm13 = vmand %vm2776_vm11, %vm283_vm1 }
 0xdc4   : > { %3793 = vpow2.f32 %v3230_v39  ;;  %2792 = vadd.xlane.f32.xlu1 %v3232_v40  ;;  %v3231_v5 = vsel %vm2777_vm13, 1.0, %v3998_v2 }
 0xdc5   : > { %2780 = vadd.xlane.f32.xlu0 %v3231_v5 }
 0xdcd   : > { %v3792_v43 = vpop.eup %3791 }
 0xdce   : > { %v3794_v44 = vpop.eup %3793  ;;  %v2762_v58 = vadd.f32 1.0, %v3792_v43 }
 0xdcf   : > { %v2769_v59 = vadd.f32 1.0, %v3794_v44 }
 0xdd0   : > { %3795 = vrcp.f32 %v2762_v58 }
 0xdd1   : > { %3797 = vrcp.f32 %v2769_v59 }
 0xdd2   : > { %3799 = vtanh.f32 %v2757_v26 }
 0xdda   : > { %v3796_v3 = vpop.eup %3795 }
 0xddb   : > { %2772 = vrot.lane.b32.xlu0 %v3796_v3, %s4001_s24  ;;  %v3798_v56 = vpop.eup %3797 }
 0xddc   : > { %v3800_v25 = vpop.eup %3799 }
 0xddd   : > { %v2809_v27 = vmul.f32 %v3800_v25, %v3796_v3 }
 0xddf   : > { %2774 = vrot.lane.b32.xlu0 %v3798_v56, %s4001_s24 }
 0xe51   : > { %v2793_v60 = vpop.xlane.xlu1 %2792 }
 0xe52   : > { %v2794_v31 = vrot.slane %v2793_v60, 4  ;;  %v2781_v7 = vpop.xlane.xlu0 %2780 }
 0xe53   : > { %v2782_v9 = vrot.slane %v2781_v7, 4 }
 0xe54   : > { %v2795_v11 = vadd.f32 %v2794_v31, %v2793_v60 }
 0xe55   : > { %v2783_v12 = vadd.f32 %v2782_v9, %v2781_v7 }
 0xe56   : > { %v2796_v2 = vrot.slane %v2795_v11, 2  ;;  %v2773_v54 = vpop.permute.xlu0 %2772 }
 0xe57   : > { %v2784_v14 = vrot.slane %v2783_v12, 2  ;;  %v2819_v29 = vmul.f32 %v2773_v54, %v4681_v48 }
 0xe58   : > { %v2797_v15 = vadd.f32 %v2796_v2, %v2795_v11 }
 0xe59   : > { %v2785_v17 = vadd.f32 %v2784_v14, %v2783_v12 }
 0xe5a   : > { %v2798_v18 = vrot.slane %v2797_v15, 1 }
 0xe5b   : > { %v2786_v21 = vrot.slane %v2785_v17, 1 }
 0xe5c   : > { %v2799_v24 = vadd.f32 %v2798_v18, %v2797_v15 }
 0xe5d   : > { %v2787_v42 = vadd.f32 %v2786_v21, %v2785_v17 }
 0xe5f   : > { %3507 = vpush %v2787_v42 }
 0xe60   : > { %3509 = vpush %v2799_v24 }
 0xe90   : > { %s3508_s7 = spop %3507 }
 0xe91   : > { %p2802_p3 = scmp.gt.f32.partialorder %s3508_s7, 4.0  ;;  %p2806_p1 = scmp.lt.f32.partialorder %s3508_s7, 4.0 }
 0xe92   : > { %s3510_s24 = spop %3509 }
 0xe93   : > { %p2801_p11 = scmp.lt.f32.partialorder %s3510_s24, 4.0  ;;  %p2805_p7 = scmp.gt.f32.partialorder %s3510_s24, 4.0 }
 0xe95   : > { %p2803_p10 = pnand %p2802_p3, %p2801_p11  ;;  %p2807_p13 = pnand %p2806_p1, %p2805_p7 }
 0xe97   : > { %s3233_s10 = scalar_select %p2807_p13, 0, 1 }
 0xe98   : > { %s3234_s12 = scalar_select %p2803_p10, 0, 1 }
 0xe99   : > { %v2811_v61 = vstv %s3233_s10 }
 0xe9a   : > { %vm2812_vm1 = vcmp.eq.s32.totalorder %v2811_v61, 1  ;;  %v2815_v28 = vstv %s3234_s12 }
 0xe9b   : > { %v2813_v62 = vsel %vm2812_vm1, %v3800_v25, %v2809_v27  ;;  %vm2816_vm3 = vcmp.eq.s32.totalorder %v2815_v28, 1 }
 0xe9c   : > { %v2817_v6 = vsel %vm2816_vm3, %v3796_v3, %v2813_v62 }
 0xe9d   : > { %v2820_v63 = vadd.f32 %v2819_v29, %v2817_v6 }
 0xe9f   : > { %3801 = vtanh.f32 %v2820_v63  ;;  %2824 = vst [vmem:[#allocation10] sm:$0xff] %v2820_v63 }
 0xea0   : > { %3902 = shalt.err (!%p3899_p12)
}
 0xea1   : > { %s3903_s11 = scalar_lea.hbm %s4776_s5, 128  ;;  %p4792_p1 = pmov %p4791_p0 }
 0xea2   : > { %p3904_p3 = scmp.ne.s32.totalorder %s4776_s5, %s3903_s11  ;;  %p3909_p10 = scmp.lt.u32.totalorder %s3903_s11, %s4776_s5 }
 0xea4   : > { %p3905_p11 = pnand %p3904_p3, %p4792_p1 }
 0xea6   : > { %p3906_p7 = pneg %p3905_p11 }
 0xea8   : > { %p3911_p13 = pnand %p3909_p10, %p3906_p7 }
 0xeaa   : > { %3914 = shalt.err (!%p3911_p13)
}
 0xeab   : > { %p4793_p2 = pmov %p4791_p0  ;;  %s3243_s10 = sshll.u32 %s4057_s22, 10  ;;  %v3802_v0 = vpop.eup %3801  ;;  %v2775_v1 = vpop.permute.xlu0 %2774 }
 0xeac   : > { %s2841_s12 = sshll.u32 %s4224_s30, 4  ;;  %s4720_s26 = scalar_lea.hbm %s4775_s4, %s3243_s10  ;;  %v2822_v16 = vmul.f32 %v3802_v0, %v2775_v1  ;;  %s4722_s12 = int_to_ptr.vmem [resolvable:$true] %s2841_s12 }
 0xead   : > { %3523 = dma.vmem_to_hbm [thread:$0]  (%p4793_p2), %s2856_s15, 128, %s4776_s5, [#allocation11]  }
 0xeae   : > { %2823 = vst [vmem:[#allocation2] sm:$0xff] %v2822_v16  ;;  %3235 = vst [vmem:[%s4224_s30 + $0x38] sm:$0xff] %v2822_v16  ;;  %s2828_s9 = scalar_lea.sflag [#allocation5], %s4209_s29  ;;  %s3915_s11 = scalar_lea.vmem %s4722_s12, 1024 }
 0xeaf   : > { %p3916_p0 = scmp.ne.s32.totalorder %s4722_s12, %s3915_s11  ;;  %p4794_p6 = scmp.ne.s32.totalorder %s4785_s16, 0 }
 0xeb0   : > { %s4003_s15 = smov [#allocation9]  }
 0xeb1   : > { %p3917_p8 = pnand %p3916_p0, %p4794_p6  ;;  %s3919_s28 = sshll.u32 %s4003_s15, 4  ;;  %s3920_s28 = int_to_ptr.vmem [resolvable:$false] %s3919_s28 }
 0xeb2   : > { %s3921_s23 = scalar_lea.vmem %s3920_s28, 2048  ;;  %p3922_p5 = scmp.lt.s32.totalorder %s4722_s12, %s3920_s28 }
 0xeb3   : > { %p3918_p4 = pneg %p3917_p8  ;;  %p3923_p9 = scmp.lt.s32.totalorder %s3921_s23, %s3915_s11 }
 0xeb5   : > { %p3924_p12 = por %p3923_p9, %p3922_p5 }
 0xeb7   : > { %p3925_p3 = pnand %p3924_p12, %p3918_p4 }
 0xeb9   : > { %3928 = shalt.err (!%p3925_p3)
}
 0xeba   : > { %s3929_s30 = scalar_lea.hbm %s4720_s26, 1024  ;;  %s3933_s7 = scalar_lea.hbm %s4775_s4, 2048 }
 0xebb   : > { %p3930_p1 = scmp.ne.s32.totalorder %s4720_s26, %s3929_s30  ;;  %p3934_p10 = scmp.lt.u32.totalorder %s4720_s26, %s4775_s4 }
 0xebc   : > { %p3935_p13 = scmp.lt.u32.totalorder %s3933_s7, %s3929_s30  ;;  %p3937_p0 = scmp.lt.u32.totalorder %s3929_s30, %s4720_s26 }
 0xebd   : > { %p3931_p11 = pnand %p3930_p1, %p4794_p6 }
 0xebe   : > { %p3936_p2 = por %p3935_p13, %p3934_p10 }
 0xebf   : > { %p3932_p7 = pneg %p3931_p11 }
 0xec0   : > { %p3938_p8 = por %p3937_p0, %p3936_p2 }
 0xec2   : > { %p3939_p4 = pnand %p3938_p8, %p3932_p7 }
 0xec4   : > { %3942 = shalt.err (!%p3939_p4)
}
 0xec5   : > { %s4004_s13 = smov 128   ;;  %s4005_s6 = smov 8  }
 0xec6   : > { %3521 = dma.vmem_to_hbm [thread:$0]  (%p4794_p6), %s4722_s12, 1024, %s4720_s26, %s2828_s9, %s4004_s13, %s4004_s13, %s4005_s6  }
 0xec7   : > { %p4795_p5 = scmp.eq.s32.totalorder %s4057_s22, 1 }
 0xec9   : > { %3968 = dma.done.wait (%p4795_p5), [#allocation11], 128   ;;  %p4796_p9 = pmov %p4795_p5 }
 0xecb   : > { %3970 = vsyncadd (%p4796_p9), [#allocation11], 4294967168 }
 0xecc PF: > { %s2871_s11 = sand.u32 1, %s3977_s18   ;;  %p4797_p12 = scmp.ne.s32.totalorder %s4781_s25, 0 }
 0xecd   : > { %p4798_p3 = scmp.ge.s32.totalorder %s3989_s21, 2  ;;  %s2872_s15 = scalar_lea.sflag [#allocation5], %s2871_s11 }
 0xecf   : > { %p3539_p1 = pnand %p4798_p3, %p4797_p12 }
 0xed1   : > { %3972 = dma.done.wait (!%p3539_p1), %s2872_s15, 1024  }
 0xed2   : > { %3974 = vsyncadd (!%p3539_p1), %s2872_s15, 4294966272  ;;  %p21_p6 = scmp.ge.s32.totalorder %s4147_s14, 4   ;;  %s4799_s18 = smov %s3981_s19 }
 0xed3   : > { %s4800_s19 = smov %s3985_s20  ;;  %s4801_s20 = smov %s4163_s17 }
 0xed4   : > { %s4802_s21 = smov %s4147_s14  ;;  %23 = sbr.rel (!%p21_p6) target bundleno = 7 (0x7), region = 115 }
 0xedb   :  { %2877 = vsyncpa [#allocation4], 1 }
 0xedc   :  { %2879 = vsyncpa [#allocation4 + $0x1], 1 }
 0xedd   :  { %2880 = vsyncpa [#allocation7], 1 }
 0xede   :  { %2881 = vsyncpa [#allocation5], 1 }
 0xedf   :  { %2883 = vsyncpa [#allocation5 + $0x1], 1 }
 0xee0   :  { %2884 = vsyncpa [#allocation11], 1 }

</bundles_post_ra>
